<compile_context>
chip_gen: v6e
topology: v6e:2x2x1
jax: 0.10.0
libtpu: 0.0.40
codegen_flags: <defaults>
</compile_context>

<pallas_src>
import functools

import jax
import jax.numpy as jnp
from jax import lax
from jax.experimental import pallas as pl
from jax.experimental.pallas import tpu as pltpu

BPAD = 8       # batch padded to the 8-sublane minimum -> full-vreg per-step tiles
OUT_PAD = 128  # lane-dense padded width of the fused actor/critic head output


def _rac_kernel(x_ref, h0_ref, c0_ref,
                wfe_ref, bfe_ref, wih_ref, whh_ref, blstm_ref,
                wh1_ref, bh1_ref, wh2_ref, bh2_ref,
                head_ref, h_out_ref, c_out_ref,
                pre_ref, h_scr, c_scr,
                *, seq_len, chunk, hidden):
    f32 = jnp.float32
    bf16 = jnp.bfloat16
    H = hidden

    k = pl.program_id(0)
    last = pl.num_programs(0) - 1

    @pl.when(k == 0)
    def _init():
        h_scr[...] = h0_ref[...]
        c_scr[...] = c0_ref[...]

    # ---- Hoisted input-side matmuls for this T-chunk: (chunk*8, .) MXU passes ----
    ft = jnp.maximum(
        jnp.dot(x_ref[...], wfe_ref[...], preferred_element_type=f32) + bfe_ref[...],
        0.0)                                                              # (chunk*8, H) f32
    pre_ref[...] = (jnp.dot(ft.astype(bf16), wih_ref[...], preferred_element_type=f32)
                    + blstm_ref[...])                                     # (chunk*8, 4H) f32

    # Padded timesteps only exist when T is not a multiple of chunk (static Python bool).
    need_mask = (seq_len % chunk) != 0

    # ---- Serial recurrence: only (8,H)@(H,4H) + gate math remains on the critical path ----
    def step(t, carry):
        h, c = carry
        row = pl.multiple_of(t * BPAD, BPAD)
        gates = pre_ref[pl.ds(row, BPAD), :] + jnp.dot(
            h.astype(bf16), whh_ref[...], preferred_element_type=f32)     # (8, 4H) f32
        i_g = jax.nn.sigmoid(gates[:, 0:H])
        f_g = jax.nn.sigmoid(gates[:, H:2 * H])
        g_g = jnp.tanh(gates[:, 2 * H:3 * H])
        o_g = jax.nn.sigmoid(gates[:, 3 * H:4 * H])
        c_new = f_g * c + i_g * g_g
        h_new = o_g * jnp.tanh(c_new)
        if need_mask:
            # Arithmetic blend with a dynamic scalar mask (skip padded steps in the last chunk).
            m = ((k * chunk + t) < seq_len).astype(f32)
            h_new = h_new * m + h * (1.0 - m)
            c_new = c_new * m + c * (1.0 - m)
        return h_new, c_new

    h, c = lax.fori_loop(0, chunk, step, (h_scr[...], c_scr[...]),
                         unroll=min(chunk, 8))
    h_scr[...] = h
    c_scr[...] = c

    # ---- Fused actor + critic heads, lane-dense (8, 128) output slab (last chunk only) ----
    @pl.when(k == last)
    def _finalize():
        head1 = jnp.maximum(
            jnp.dot(h.astype(bf16), wh1_ref[...], preferred_element_type=f32)
            + bh1_ref[...], 0.0)                                          # (8, 2H) f32
        head_ref[...] = (jnp.dot(head1.astype(bf16), wh2_ref[...],
                                 preferred_element_type=f32) + bh2_ref[...])
        h_out_ref[...] = h
        c_out_ref[...] = c


def pack_params(params):
    """One-time packing: bf16 matmul weights, fused & lane-padded actor/critic heads."""
    bf16 = jnp.bfloat16
    H = params["wfe"].shape[1]
    out_dim = params["wa2"].shape[1]
    assert out_dim + 1 <= OUT_PAD

    # Fused first head layer: [actor | critic] -> (H, 2H)
    wh1 = jnp.concatenate([params["wa1"], params["wc1"]], axis=1)
    bh1 = jnp.concatenate([params["ba1"], params["bc1"]], axis=1)
    # Fused, block-diagonal, lane-padded second layer -> (2H, OUT_PAD)
    top = jnp.concatenate(
        [params["wa2"], jnp.zeros((H, OUT_PAD - out_dim), jnp.float32)], axis=1)
    bot = jnp.concatenate(
        [jnp.zeros((H, out_dim), jnp.float32), params["wc2"],
         jnp.zeros((H, OUT_PAD - out_dim - 1), jnp.float32)], axis=1)
    wh2 = jnp.concatenate([top, bot], axis=0)
    bh2 = jnp.concatenate(
        [params["ba2"], params["bc2"],
         jnp.zeros((1, OUT_PAD - out_dim - 1), jnp.float32)], axis=1)

    return dict(
        wfe=params["wfe"].astype(bf16), bfe=params["bfe"],
        wih=params["wih"].astype(bf16), whh=params["whh"].astype(bf16),
        blstm=params["blstm"],
        wh1=wh1.astype(bf16), bh1=bh1,
        wh2=wh2.astype(bf16), bh2=bh2,
        out_dim=out_dim, hidden_dim=H,
    )


def recurrent_actor_critic_forward(x, packed, hidden=None, chunk=64):
    """Pallas forward. Returns (action_logits, state_value, (h, c)) like the PyTorch module."""
    B, T, Din = x.shape
    H = packed["hidden_dim"]
    out_dim = packed["out_dim"]
    assert H % 128 == 0, "gate slices must stay lane-aligned: hidden_dim must be a multiple of 128"
    assert B <= BPAD, "TODO(synk): tile batch across a parallel grid axis for B > 8"

    chunk = max(1, min(chunk, T))
    n_chunks = pl.cdiv(T, chunk)
    t_pad = n_chunks * chunk

    # Single fused producer: pad batch->8 sublanes, pad time->chunk multiple, time-major,
    # bf16 MXU operand, flattened to a 2-D (t_pad*8, Din) slab (no in-kernel reshape needed).
    x_tm = jnp.zeros((t_pad, BPAD, Din), jnp.bfloat16)
    x_tm = x_tm.at[:T, :B, :].set(jnp.transpose(x, (1, 0, 2)).astype(jnp.bfloat16))
    x_flat = x_tm.reshape(t_pad * BPAD, Din)

    if hidden is None:   # PyTorch path: self.hidden is None -> zero-initialized state
        h0 = jnp.zeros((BPAD, H), jnp.float32)
        c0 = jnp.zeros((BPAD, H), jnp.float32)
    else:
        h0 = jnp.zeros((BPAD, H), jnp.float32).at[:B].set(
            hidden[0].reshape(B, H).astype(jnp.float32))
        c0 = jnp.zeros((BPAD, H), jnp.float32).at[:B].set(
            hidden[1].reshape(B, H).astype(jnp.float32))

    def full(a):   # whole-array block, resident across the sequential grid axis
        return pl.BlockSpec(a.shape, lambda kk, nd=a.ndim: (0,) * nd)

    weights = [packed["wfe"], packed["bfe"], packed["wih"], packed["whh"], packed["blstm"],
               packed["wh1"], packed["bh1"], packed["wh2"], packed["bh2"]]

    in_specs = ([pl.BlockSpec((chunk * BPAD, Din), lambda kk: (kk, 0)),
                 full(h0), full(c0)] + [full(w) for w in weights])

    out_shape = (jax.ShapeDtypeStruct((BPAD, OUT_PAD), jnp.float32),
                 jax.ShapeDtypeStruct((BPAD, H), jnp.float32),
                 jax.ShapeDtypeStruct((BPAD, H), jnp.float32))
    out_specs = (pl.BlockSpec((BPAD, OUT_PAD), lambda kk: (0, 0)),
                 pl.BlockSpec((BPAD, H), lambda kk: (0, 0)),
                 pl.BlockSpec((BPAD, H), lambda kk: (0, 0)))

    kernel = functools.partial(_rac_kernel, seq_len=T, chunk=chunk, hidden=H)
    head, h, c = pl.pallas_call(
        kernel,
        out_shape=out_shape,
        grid_spec=pltpu.PrefetchScalarGridSpec(
            num_scalar_prefetch=0,
            grid=(n_chunks,),
            in_specs=in_specs,
            out_specs=out_specs,
            scratch_shapes=[
                pltpu.VMEM((chunk * BPAD, 4 * H), jnp.float32),   # per-chunk pre_gates
                pltpu.VMEM((BPAD, H), jnp.float32),               # h carried across chunks
                pltpu.VMEM((BPAD, H), jnp.float32),               # c carried across chunks
            ]),
        compiler_params=pltpu.CompilerParams(
            dimension_semantics=("arbitrary",),
            # Chunk sizing keeps usage at a few MiB; 32 MiB is >= default scoped VMEM on all
            # of v5e/v6e/v7x and well under every chip's physical VMEM.
            vmem_limit_bytes=32 * 1024 * 1024),
    )(x_flat, h0, c0, *weights)

    logits = head[:B, :out_dim]
    value = head[:B, out_dim:out_dim + 1]
    # PyTorch hidden state has shape (num_layers=1, B, H)
    return logits, value, (h[None, :B, :], c[None, :B, :])


def init_params(key, input_dim, output_dim, hidden_dim):
    """Deterministic PyTorch-style uniform(-1/sqrt(fan_in), 1/sqrt(fan_in)) init."""
    ks = jax.random.split(key, 14)

    def unif(k, shape, fan_in):
        bound = 1.0 / jnp.sqrt(jnp.float32(fan_in))
        return jax.random.uniform(k, shape, jnp.float32, -bound, bound)

    H = hidden_dim
    return dict(
        # feature_extractor Linear(input_dim -> H)
        wfe=unif(ks[0], (input_dim, H), input_dim),
        bfe=unif(ks[1], (1, H), input_dim),
        # LSTM(H -> H): weight_ih, weight_hh pre-transposed to (H, 4H); biases folded
        wih=unif(ks[2], (H, 4 * H), H),
        whh=unif(ks[3], (H, 4 * H), H),
        blstm=(unif(ks[4], (1, 4 * H), H) + unif(ks[5], (1, 4 * H), H)),  # b_ih + b_hh
        # actor: Linear(H->H), Linear(H->out)
        wa1=unif(ks[6], (H, H), H),
        ba1=unif(ks[7], (1, H), H),
        wa2=unif(ks[8], (H, output_dim), H),
        ba2=unif(ks[9], (1, output_dim), H),
        # critic: Linear(H->H), Linear(H->1)
        wc1=unif(ks[10], (H, H), H),
        bc1=unif(ks[11], (1, H), H),
        wc2=unif(ks[12], (H, 1), H),
        bc2=unif(ks[13], (1, 1), H),
    )


def reference_forward(x, p):
    """Pure-f32 JAX reference (mirrors the PyTorch semantics exactly)."""
    B, T, _ = x.shape
    H = p["wfe"].shape[1]
    h = jnp.zeros((B, H), jnp.float32)
    c = jnp.zeros((B, H), jnp.float32)
    for t in range(T):
        ft = jnp.maximum(x[:, t, :] @ p["wfe"] + p["bfe"], 0.0)
        gates = ft @ p["wih"] + h @ p["whh"] + p["blstm"]
        i_g = jax.nn.sigmoid(gates[:, 0:H])
        f_g = jax.nn.sigmoid(gates[:, H:2 * H])
        g_g = jnp.tanh(gates[:, 2 * H:3 * H])
        o_g = jax.nn.sigmoid(gates[:, 3 * H:4 * H])
        c = f_g * c + i_g * g_g
        h = o_g * jnp.tanh(c)
    a_h = jnp.maximum(h @ p["wa1"] + p["ba1"], 0.0)
    logits = a_h @ p["wa2"] + p["ba2"]
    c_h = jnp.maximum(h @ p["wc1"] + p["bc1"], 0.0)
    value = c_h @ p["wc2"] + p["bc2"]
    return logits, value, (h[None], c[None])


def reference_forward_bf16_operands(x, p, hidden=None):
    """Same math but with matmul operands rounded to bf16 (f32 accumulate),
    matching what the kernel feeds the MXU. Used for the tight correctness check."""
    f32 = jnp.float32

    def dot(a, b):
        return jnp.dot(a.astype(jnp.bfloat16), b.astype(jnp.bfloat16),
                       preferred_element_type=f32)

    B, T, _ = x.shape
    H = p["wfe"].shape[1]
    if hidden is None:
        h = jnp.zeros((B, H), f32)
        c = jnp.zeros((B, H), f32)
    else:
        h = hidden[0].reshape(B, H).astype(f32)
        c = hidden[1].reshape(B, H).astype(f32)
    for t in range(T):
        ft = jnp.maximum(dot(x[:, t, :], p["wfe"]) + p["bfe"], 0.0)
        gates = dot(ft, p["wih"]) + p["blstm"] + dot(h, p["whh"])
        i_g = jax.nn.sigmoid(gates[:, 0:H])
        f_g = jax.nn.sigmoid(gates[:, H:2 * H])
        g_g = jnp.tanh(gates[:, 2 * H:3 * H])
        o_g = jax.nn.sigmoid(gates[:, 3 * H:4 * H])
        c = f_g * c + i_g * g_g
        h = o_g * jnp.tanh(c)
    a_h = jnp.maximum(dot(h, p["wa1"]) + p["ba1"], 0.0)
    logits = dot(a_h, p["wa2"]) + p["ba2"]
    c_h = jnp.maximum(dot(h, p["wc1"]) + p["bc1"], 0.0)
    value = dot(c_h, p["wc2"]) + p["bc2"]
    return logits, value, (h[None], c[None])


if __name__ == "__main__":
    B, T = 2, 8
    input_dim, output_dim, hidden_dim = 32, 6, 128

    key = jax.random.PRNGKey(0)
    k_x, k_p, k_x2 = jax.random.split(key, 3)
    x = jax.random.normal(k_x, (B, T, input_dim), jnp.float32)
    params = init_params(k_p, input_dim, output_dim, hidden_dim)
    packed = pack_params(params)

    # --- single-chunk path (T=8 -> one grid step) ---
    logits, value, (h, c) = recurrent_actor_critic_forward(x, packed)
    jax.block_until_ready((logits, value, h, c))
    assert logits.shape == (B, output_dim)
    assert value.shape == (B, 1)
    assert h.shape == (1, B, hidden_dim) and c.shape == (1, B, hidden_dim)

    # Tight check vs. a reference that quantizes matmul operands to bf16 like the kernel.
    tl, tv, (th, tc) = reference_forward_bf16_operands(x, params)
    assert jnp.allclose(logits, tl, atol=2e-3, rtol=2e-3)
    assert jnp.allclose(value, tv, atol=2e-3, rtol=2e-3)
    assert jnp.allclose(h, th, atol=2e-3, rtol=2e-3)
    assert jnp.allclose(c, tc, atol=2e-3, rtol=2e-3)

    # Sanity check vs. the pure-f32 PyTorch-equivalent reference (looser tolerance).
    rl, rv, (rh, rc) = reference_forward(x, params)
    assert jnp.allclose(logits, rl, atol=5e-2, rtol=5e-2)
    assert jnp.allclose(value, rv, atol=5e-2, rtol=5e-2)
    assert jnp.allclose(h, rh, atol=5e-2, rtol=5e-2)
    assert jnp.allclose(c, rc, atol=5e-2, rtol=5e-2)

    # --- multi-chunk grid path with a partial final chunk (T=11, chunk=4 -> 3 grid steps) ---
    T2 = 11
    x2 = jax.random.normal(k_x2, (B, T2, input_dim), jnp.float32)
    l2, v2, (h2, c2) = recurrent_actor_critic_forward(x2, packed, chunk=4)
    jax.block_until_ready((l2, v2, h2, c2))
    tl2, tv2, (th2, tc2) = reference_forward_bf16_operands(x2, params)
    assert jnp.allclose(l2, tl2, atol=5e-3, rtol=5e-3)
    assert jnp.allclose(v2, tv2, atol=5e-3, rtol=5e-3)
    assert jnp.allclose(h2, th2, atol=5e-3, rtol=5e-3)
    assert jnp.allclose(c2, tc2, atol=5e-3, rtol=5e-3)

    # --- explicit hidden-state-in path (PyTorch forward(x, hidden=...)) ---
    l3, v3, (h3, c3) = recurrent_actor_critic_forward(x, packed, hidden=(h, c))
    jax.block_until_ready((l3, v3, h3, c3))
    tl3, tv3, (th3, tc3) = reference_forward_bf16_operands(x, params, hidden=(h, c))
    assert l3.shape == (B, output_dim) and v3.shape == (B, 1)
    assert jnp.allclose(l3, tl3, atol=5e-3, rtol=5e-3)
    assert jnp.allclose(v3, tv3, atol=5e-3, rtol=5e-3)

    print("KERNEL_OK")
</pallas_src>

<mosaic_0001>
module attributes {stable_mosaic.version = 11 : i64} {
  func.func @_rac_kernel(%arg0: i32, %arg1: memref<64x32xbf16, #tpu.memory_space<vmem>>, %arg2: memref<8x128xf32, #tpu.memory_space<vmem>>, %arg3: memref<8x128xf32, #tpu.memory_space<vmem>>, %arg4: memref<32x128xbf16, #tpu.memory_space<vmem>>, %arg5: memref<1x128xf32, #tpu.memory_space<vmem>>, %arg6: memref<128x512xbf16, #tpu.memory_space<vmem>>, %arg7: memref<128x512xbf16, #tpu.memory_space<vmem>>, %arg8: memref<1x512xf32, #tpu.memory_space<vmem>>, %arg9: memref<128x256xbf16, #tpu.memory_space<vmem>>, %arg10: memref<1x256xf32, #tpu.memory_space<vmem>>, %arg11: memref<256x128xbf16, #tpu.memory_space<vmem>>, %arg12: memref<1x128xf32, #tpu.memory_space<vmem>>, %arg13: memref<8x128xf32, #tpu.memory_space<vmem>>, %arg14: memref<8x128xf32, #tpu.memory_space<vmem>>, %arg15: memref<8x128xf32, #tpu.memory_space<vmem>>, %arg16: memref<64x512xf32, #tpu.memory_space<vmem>>, %arg17: memref<8x128xf32, #tpu.memory_space<vmem>>, %arg18: memref<8x128xf32, #tpu.memory_space<vmem>>) attributes {dimension_semantics = [#tpu.dimension_semantics<arbitrary>], iteration_bounds = array<i64: 1>, scalar_prefetch = 0 : i64, scratch_operands = 3 : i64, tpu.core_type = #tpu.core_type<tc>, window_params = [{transform_indices = @transform_0, window_bounds = array<i64: 64, 32>}, {pipeline_mode = #tpu.pipeline_mode<synchronous>, transform_indices = @transform_1, window_bounds = array<i64: 8, 128>}, {pipeline_mode = #tpu.pipeline_mode<synchronous>, transform_indices = @transform_2, window_bounds = array<i64: 8, 128>}, {pipeline_mode = #tpu.pipeline_mode<synchronous>, transform_indices = @transform_3, window_bounds = array<i64: 32, 128>}, {pipeline_mode = #tpu.pipeline_mode<synchronous>, transform_indices = @transform_4, window_bounds = array<i64: 1, 128>}, {pipeline_mode = #tpu.pipeline_mode<synchronous>, transform_indices = @transform_5, window_bounds = array<i64: 128, 512>}, {pipeline_mode = #tpu.pipeline_mode<synchronous>, transform_indices = @transform_6, window_bounds = array<i64: 128, 512>}, {pipeline_mode = #tpu.pipeline_mode<synchronous>, transform_indices = @transform_7, window_bounds = array<i64: 1, 512>}, {pipeline_mode = #tpu.pipeline_mode<synchronous>, transform_indices = @transform_8, window_bounds = array<i64: 128, 256>}, {pipeline_mode = #tpu.pipeline_mode<synchronous>, transform_indices = @transform_9, window_bounds = array<i64: 1, 256>}, {pipeline_mode = #tpu.pipeline_mode<synchronous>, transform_indices = @transform_10, window_bounds = array<i64: 256, 128>}, {pipeline_mode = #tpu.pipeline_mode<synchronous>, transform_indices = @transform_11, window_bounds = array<i64: 1, 128>}, {pipeline_mode = #tpu.pipeline_mode<synchronous>, transform_indices = @transform_12, window_bounds = array<i64: 8, 128>}, {pipeline_mode = #tpu.pipeline_mode<synchronous>, transform_indices = @transform_13, window_bounds = array<i64: 8, 128>}, {pipeline_mode = #tpu.pipeline_mode<synchronous>, transform_indices = @transform_14, window_bounds = array<i64: 8, 128>}]} {
    %c0_i32 = arith.constant 0 : i32
    %0 = arith.cmpi eq, %arg0, %c0_i32 : i32
    %1 = arith.extui %0 : i1 to i32
    %c0_i32_0 = arith.constant 0 : i32
    %2 = arith.cmpi ne, %1, %c0_i32_0 : i32
    scf.if %2 {
      %c0_89 = arith.constant 0 : index
      %c0_90 = arith.constant 0 : index
      %289 = vector.load %arg2[%c0_89, %c0_90] : memref<8x128xf32, #tpu.memory_space<vmem>>, vector<8x128xf32>
      %c0_91 = arith.constant 0 : index
      %c0_92 = arith.constant 0 : index
      %290 = vector.load %arg17[%c0_91, %c0_92] : memref<8x128xf32, #tpu.memory_space<vmem>>, vector<8x128xf32>
      tpu.vector_store %arg17[%c0_91, %c0_92], %289 {strides = array<i32>} : memref<8x128xf32, #tpu.memory_space<vmem>>, vector<8x128xf32>,
      %c0_93 = arith.constant 0 : index
      %c0_94 = arith.constant 0 : index
      %291 = vector.load %arg3[%c0_93, %c0_94] : memref<8x128xf32, #tpu.memory_space<vmem>>, vector<8x128xf32>
      %c0_95 = arith.constant 0 : index
      %c0_96 = arith.constant 0 : index
      %292 = vector.load %arg18[%c0_95, %c0_96] : memref<8x128xf32, #tpu.memory_space<vmem>>, vector<8x128xf32>
      tpu.vector_store %arg18[%c0_95, %c0_96], %291 {strides = array<i32>} : memref<8x128xf32, #tpu.memory_space<vmem>>, vector<8x128xf32>,
    } else {
    }
    %c0 = arith.constant 0 : index
    %c0_1 = arith.constant 0 : index
    %3 = vector.load %arg1[%c0, %c0_1] : memref<64x32xbf16, #tpu.memory_space<vmem>>, vector<64x32xbf16>
    %c0_2 = arith.constant 0 : index
    %c0_3 = arith.constant 0 : index
    %4 = vector.load %arg4[%c0_2, %c0_3] : memref<32x128xbf16, #tpu.memory_space<vmem>>, vector<32x128xbf16>
    %cst = arith.constant dense<0.000000e+00> : vector<64x128xf32>
    %5 = tpu.matmul %3, %4, %cst {dimension_numbers = #tpu.dot_dimension_numbers<[1], [0], [0], [1], [0, 0, 1, 1], [], []>} : vector<64x32xbf16>, vector<32x128xbf16>, vector<64x128xf32> -> vector<64x128xf32>
    %c0_4 = arith.constant 0 : index
    %c0_5 = arith.constant 0 : index
    %6 = vector.load %arg5[%c0_4, %c0_5] : memref<1x128xf32, #tpu.memory_space<vmem>>, vector<1x128xf32>
    %7 = vector.broadcast %6 : vector<1x128xf32> to vector<64x128xf32>
    %8 = arith.addf %5, %7 : vector<64x128xf32>
    %cst_6 = arith.constant 0.000000e+00 : f32
    %9 = vector.broadcast %cst_6 : f32 to vector<64x128xf32>
    %10 = arith.maximumf %8, %9 : vector<64x128xf32>
    %11 = arith.truncf %10 : vector<64x128xf32> to vector<64x128xbf16>
    %c0_7 = arith.constant 0 : index
    %c0_8 = arith.constant 0 : index
    %12 = vector.load %arg6[%c0_7, %c0_8] : memref<128x512xbf16, #tpu.memory_space<vmem>>, vector<128x512xbf16>
    %cst_9 = arith.constant dense<0.000000e+00> : vector<64x512xf32>
    %13 = tpu.matmul %11, %12, %cst_9 {dimension_numbers = #tpu.dot_dimension_numbers<[1], [0], [0], [1], [0, 0, 1, 1], [], []>} : vector<64x128xbf16>, vector<128x512xbf16>, vector<64x512xf32> -> vector<64x512xf32>
    %c0_10 = arith.constant 0 : index
    %c0_11 = arith.constant 0 : index
    %14 = vector.load %arg8[%c0_10, %c0_11] : memref<1x512xf32, #tpu.memory_space<vmem>>, vector<1x512xf32>
    %15 = vector.broadcast %14 : vector<1x512xf32> to vector<64x512xf32>
    %16 = arith.addf %13, %15 : vector<64x512xf32>
    %c0_12 = arith.constant 0 : index
    %c0_13 = arith.constant 0 : index
    %17 = vector.load %arg16[%c0_12, %c0_13] : memref<64x512xf32, #tpu.memory_space<vmem>>, vector<64x512xf32>
    tpu.vector_store %arg16[%c0_12, %c0_13], %16 {strides = array<i32>} : memref<64x512xf32, #tpu.memory_space<vmem>>, vector<64x512xf32>,
    %c0_14 = arith.constant 0 : index
    %c0_15 = arith.constant 0 : index
    %18 = vector.load %arg17[%c0_14, %c0_15] : memref<8x128xf32, #tpu.memory_space<vmem>>, vector<8x128xf32>
    %c0_16 = arith.constant 0 : index
    %c0_17 = arith.constant 0 : index
    %19 = vector.load %arg18[%c0_16, %c0_17] : memref<8x128xf32, #tpu.memory_space<vmem>>, vector<8x128xf32>
    %c0_i32_18 = arith.constant 0 : i32
    %c8_i32 = arith.constant 8 : i32
    %20 = arith.muli %c0_i32_18, %c8_i32 : i32
    %21 = tpu.assume_multiple %20, 8 : i32
    %22 = arith.index_cast %21 : i32 to index
    %c0_19 = arith.constant 0 : index
    %23 = vector.load %arg16[%22, %c0_19] : memref<64x512xf32, #tpu.memory_space<vmem>>, vector<8x512xf32>
    %24 = arith.truncf %18 : vector<8x128xf32> to vector<8x128xbf16>
    %c0_20 = arith.constant 0 : index
    %c0_21 = arith.constant 0 : index
    %25 = vector.load %arg7[%c0_20, %c0_21] : memref<128x512xbf16, #tpu.memory_space<vmem>>, vector<128x512xbf16>
    %cst_22 = arith.constant dense<0.000000e+00> : vector<8x512xf32>
    %26 = tpu.matmul %24, %25, %cst_22 {dimension_numbers = #tpu.dot_dimension_numbers<[1], [0], [0], [1], [0, 0, 1, 1], [], []>} : vector<8x128xbf16>, vector<128x512xbf16>, vector<8x512xf32> -> vector<8x512xf32>
    %27 = arith.addf %23, %26 : vector<8x512xf32>
    %28 = vector.extract_strided_slice %27 {offsets = [0, 0], sizes = [8, 128], strides = [1, 1]} : vector<8x512xf32> to vector<8x128xf32>
    %29 = arith.negf %28 : vector<8x128xf32>
    %30 = math.exp %29 : vector<8x128xf32>
    %cst_23 = arith.constant 1.000000e+00 : f32
    %31 = vector.broadcast %cst_23 : f32 to vector<8x128xf32>
    %32 = arith.addf %31, %30 : vector<8x128xf32>
    %33 = arith.divf %31, %32 : vector<8x128xf32>
    %34 = vector.extract_strided_slice %27 {offsets = [0, 128], sizes = [8, 128], strides = [1, 1]} : vector<8x512xf32> to vector<8x128xf32>
    %35 = arith.negf %34 : vector<8x128xf32>
    %36 = math.exp %35 : vector<8x128xf32>
    %cst_24 = arith.constant 1.000000e+00 : f32
    %37 = vector.broadcast %cst_24 : f32 to vector<8x128xf32>
    %38 = arith.addf %37, %36 : vector<8x128xf32>
    %39 = arith.divf %37, %38 : vector<8x128xf32>
    %40 = vector.extract_strided_slice %27 {offsets = [0, 256], sizes = [8, 128], strides = [1, 1]} : vector<8x512xf32> to vector<8x128xf32>
    %41 = math.tanh %40 : vector<8x128xf32>
    %42 = vector.extract_strided_slice %27 {offsets = [0, 384], sizes = [8, 128], strides = [1, 1]} : vector<8x512xf32> to vector<8x128xf32>
    %43 = arith.negf %42 : vector<8x128xf32>
    %44 = math.exp %43 : vector<8x128xf32>
    %cst_25 = arith.constant 1.000000e+00 : f32
    %45 = vector.broadcast %cst_25 : f32 to vector<8x128xf32>
    %46 = arith.addf %45, %44 : vector<8x128xf32>
    %47 = arith.divf %45, %46 : vector<8x128xf32>
    %48 = arith.mulf %39, %19 : vector<8x128xf32>
    %49 = arith.mulf %33, %41 : vector<8x128xf32>
    %50 = arith.addf %48, %49 : vector<8x128xf32>
    %51 = math.tanh %50 : vector<8x128xf32>
    %52 = arith.mulf %47, %51 : vector<8x128xf32>
    %c1_i32 = arith.constant 1 : i32
    %c8_i32_26 = arith.constant 8 : i32
    %53 = arith.muli %c1_i32, %c8_i32_26 : i32
    %54 = tpu.assume_multiple %53, 8 : i32
    %55 = arith.index_cast %54 : i32 to index
    %c0_27 = arith.constant 0 : index
    %56 = vector.load %arg16[%55, %c0_27] : memref<64x512xf32, #tpu.memory_space<vmem>>, vector<8x512xf32>
    %57 = arith.truncf %52 : vector<8x128xf32> to vector<8x128xbf16>
    %c0_28 = arith.constant 0 : index
    %c0_29 = arith.constant 0 : index
    %58 = vector.load %arg7[%c0_28, %c0_29] : memref<128x512xbf16, #tpu.memory_space<vmem>>, vector<128x512xbf16>
    %cst_30 = arith.constant dense<0.000000e+00> : vector<8x512xf32>
    %59 = tpu.matmul %57, %58, %cst_30 {dimension_numbers = #tpu.dot_dimension_numbers<[1], [0], [0], [1], [0, 0, 1, 1], [], []>} : vector<8x128xbf16>, vector<128x512xbf16>, vector<8x512xf32> -> vector<8x512xf32>
    %60 = arith.addf %56, %59 : vector<8x512xf32>
    %61 = vector.extract_strided_slice %60 {offsets = [0, 0], sizes = [8, 128], strides = [1, 1]} : vector<8x512xf32> to vector<8x128xf32>
    %62 = arith.negf %61 : vector<8x128xf32>
    %63 = math.exp %62 : vector<8x128xf32>
    %cst_31 = arith.constant 1.000000e+00 : f32
    %64 = vector.broadcast %cst_31 : f32 to vector<8x128xf32>
    %65 = arith.addf %64, %63 : vector<8x128xf32>
    %66 = arith.divf %64, %65 : vector<8x128xf32>
    %67 = vector.extract_strided_slice %60 {offsets = [0, 128], sizes = [8, 128], strides = [1, 1]} : vector<8x512xf32> to vector<8x128xf32>
    %68 = arith.negf %67 : vector<8x128xf32>
    %69 = math.exp %68 : vector<8x128xf32>
    %cst_32 = arith.constant 1.000000e+00 : f32
    %70 = vector.broadcast %cst_32 : f32 to vector<8x128xf32>
    %71 = arith.addf %70, %69 : vector<8x128xf32>
    %72 = arith.divf %70, %71 : vector<8x128xf32>
    %73 = vector.extract_strided_slice %60 {offsets = [0, 256], sizes = [8, 128], strides = [1, 1]} : vector<8x512xf32> to vector<8x128xf32>
    %74 = math.tanh %73 : vector<8x128xf32>
    %75 = vector.extract_strided_slice %60 {offsets = [0, 384], sizes = [8, 128], strides = [1, 1]} : vector<8x512xf32> to vector<8x128xf32>
    %76 = arith.negf %75 : vector<8x128xf32>
    %77 = math.exp %76 : vector<8x128xf32>
    %cst_33 = arith.constant 1.000000e+00 : f32
    %78 = vector.broadcast %cst_33 : f32 to vector<8x128xf32>
    %79 = arith.addf %78, %77 : vector<8x128xf32>
    %80 = arith.divf %78, %79 : vector<8x128xf32>
    %81 = arith.mulf %72, %50 : vector<8x128xf32>
    %82 = arith.mulf %66, %74 : vector<8x128xf32>
    %83 = arith.addf %81, %82 : vector<8x128xf32>
    %84 = math.tanh %83 : vector<8x128xf32>
    %85 = arith.mulf %80, %84 : vector<8x128xf32>
    %c2_i32 = arith.constant 2 : i32
    %c8_i32_34 = arith.constant 8 : i32
    %86 = arith.muli %c2_i32, %c8_i32_34 : i32
    %87 = tpu.assume_multiple %86, 8 : i32
    %88 = arith.index_cast %87 : i32 to index
    %c0_35 = arith.constant 0 : index
    %89 = vector.load %arg16[%88, %c0_35] : memref<64x512xf32, #tpu.memory_space<vmem>>, vector<8x512xf32>
    %90 = arith.truncf %85 : vector<8x128xf32> to vector<8x128xbf16>
    %c0_36 = arith.constant 0 : index
    %c0_37 = arith.constant 0 : index
    %91 = vector.load %arg7[%c0_36, %c0_37] : memref<128x512xbf16, #tpu.memory_space<vmem>>, vector<128x512xbf16>
    %cst_38 = arith.constant dense<0.000000e+00> : vector<8x512xf32>
    %92 = tpu.matmul %90, %91, %cst_38 {dimension_numbers = #tpu.dot_dimension_numbers<[1], [0], [0], [1], [0, 0, 1, 1], [], []>} : vector<8x128xbf16>, vector<128x512xbf16>, vector<8x512xf32> -> vector<8x512xf32>
    %93 = arith.addf %89, %92 : vector<8x512xf32>
    %94 = vector.extract_strided_slice %93 {offsets = [0, 0], sizes = [8, 128], strides = [1, 1]} : vector<8x512xf32> to vector<8x128xf32>
    %95 = arith.negf %94 : vector<8x128xf32>
    %96 = math.exp %95 : vector<8x128xf32>
    %cst_39 = arith.constant 1.000000e+00 : f32
    %97 = vector.broadcast %cst_39 : f32 to vector<8x128xf32>
    %98 = arith.addf %97, %96 : vector<8x128xf32>
    %99 = arith.divf %97, %98 : vector<8x128xf32>
    %100 = vector.extract_strided_slice %93 {offsets = [0, 128], sizes = [8, 128], strides = [1, 1]} : vector<8x512xf32> to vector<8x128xf32>
    %101 = arith.negf %100 : vector<8x128xf32>
    %102 = math.exp %101 : vector<8x128xf32>
    %cst_40 = arith.constant 1.000000e+00 : f32
    %103 = vector.broadcast %cst_40 : f32 to vector<8x128xf32>
    %104 = arith.addf %103, %102 : vector<8x128xf32>
    %105 = arith.divf %103, %104 : vector<8x128xf32>
    %106 = vector.extract_strided_slice %93 {offsets = [0, 256], sizes = [8, 128], strides = [1, 1]} : vector<8x512xf32> to vector<8x128xf32>
    %107 = math.tanh %106 : vector<8x128xf32>
    %108 = vector.extract_strided_slice %93 {offsets = [0, 384], sizes = [8, 128], strides = [1, 1]} : vector<8x512xf32> to vector<8x128xf32>
    %109 = arith.negf %108 : vector<8x128xf32>
    %110 = math.exp %109 : vector<8x128xf32>
    %cst_41 = arith.constant 1.000000e+00 : f32
    %111 = vector.broadcast %cst_41 : f32 to vector<8x128xf32>
    %112 = arith.addf %111, %110 : vector<8x128xf32>
    %113 = arith.divf %111, %112 : vector<8x128xf32>
    %114 = arith.mulf %105, %83 : vector<8x128xf32>
    %115 = arith.mulf %99, %107 : vector<8x128xf32>
    %116 = arith.addf %114, %115 : vector<8x128xf32>
    %117 = math.tanh %116 : vector<8x128xf32>
    %118 = arith.mulf %113, %117 : vector<8x128xf32>
    %c3_i32 = arith.constant 3 : i32
    %c8_i32_42 = arith.constant 8 : i32
    %119 = arith.muli %c3_i32, %c8_i32_42 : i32
    %120 = tpu.assume_multiple %119, 8 : i32
    %121 = arith.index_cast %120 : i32 to index
    %c0_43 = arith.constant 0 : index
    %122 = vector.load %arg16[%121, %c0_43] : memref<64x512xf32, #tpu.memory_space<vmem>>, vector<8x512xf32>
    %123 = arith.truncf %118 : vector<8x128xf32> to vector<8x128xbf16>
    %c0_44 = arith.constant 0 : index
    %c0_45 = arith.constant 0 : index
    %124 = vector.load %arg7[%c0_44, %c0_45] : memref<128x512xbf16, #tpu.memory_space<vmem>>, vector<128x512xbf16>
    %cst_46 = arith.constant dense<0.000000e+00> : vector<8x512xf32>
    %125 = tpu.matmul %123, %124, %cst_46 {dimension_numbers = #tpu.dot_dimension_numbers<[1], [0], [0], [1], [0, 0, 1, 1], [], []>} : vector<8x128xbf16>, vector<128x512xbf16>, vector<8x512xf32> -> vector<8x512xf32>
    %126 = arith.addf %122, %125 : vector<8x512xf32>
    %127 = vector.extract_strided_slice %126 {offsets = [0, 0], sizes = [8, 128], strides = [1, 1]} : vector<8x512xf32> to vector<8x128xf32>
    %128 = arith.negf %127 : vector<8x128xf32>
    %129 = math.exp %128 : vector<8x128xf32>
    %cst_47 = arith.constant 1.000000e+00 : f32
    %130 = vector.broadcast %cst_47 : f32 to vector<8x128xf32>
    %131 = arith.addf %130, %129 : vector<8x128xf32>
    %132 = arith.divf %130, %131 : vector<8x128xf32>
    %133 = vector.extract_strided_slice %126 {offsets = [0, 128], sizes = [8, 128], strides = [1, 1]} : vector<8x512xf32> to vector<8x128xf32>
    %134 = arith.negf %133 : vector<8x128xf32>
    %135 = math.exp %134 : vector<8x128xf32>
    %cst_48 = arith.constant 1.000000e+00 : f32
    %136 = vector.broadcast %cst_48 : f32 to vector<8x128xf32>
    %137 = arith.addf %136, %135 : vector<8x128xf32>
    %138 = arith.divf %136, %137 : vector<8x128xf32>
    %139 = vector.extract_strided_slice %126 {offsets = [0, 256], sizes = [8, 128], strides = [1, 1]} : vector<8x512xf32> to vector<8x128xf32>
    %140 = math.tanh %139 : vector<8x128xf32>
    %141 = vector.extract_strided_slice %126 {offsets = [0, 384], sizes = [8, 128], strides = [1, 1]} : vector<8x512xf32> to vector<8x128xf32>
    %142 = arith.negf %141 : vector<8x128xf32>
    %143 = math.exp %142 : vector<8x128xf32>
    %cst_49 = arith.constant 1.000000e+00 : f32
    %144 = vector.broadcast %cst_49 : f32 to vector<8x128xf32>
    %145 = arith.addf %144, %143 : vector<8x128xf32>
    %146 = arith.divf %144, %145 : vector<8x128xf32>
    %147 = arith.mulf %138, %116 : vector<8x128xf32>
    %148 = arith.mulf %132, %140 : vector<8x128xf32>
    %149 = arith.addf %147, %148 : vector<8x128xf32>
    %150 = math.tanh %149 : vector<8x128xf32>
    %151 = arith.mulf %146, %150 : vector<8x128xf32>
    %c4_i32 = arith.constant 4 : i32
    %c8_i32_50 = arith.constant 8 : i32
    %152 = arith.muli %c4_i32, %c8_i32_50 : i32
    %153 = tpu.assume_multiple %152, 8 : i32
    %154 = arith.index_cast %153 : i32 to index
    %c0_51 = arith.constant 0 : index
    %155 = vector.load %arg16[%154, %c0_51] : memref<64x512xf32, #tpu.memory_space<vmem>>, vector<8x512xf32>
    %156 = arith.truncf %151 : vector<8x128xf32> to vector<8x128xbf16>
    %c0_52 = arith.constant 0 : index
    %c0_53 = arith.constant 0 : index
    %157 = vector.load %arg7[%c0_52, %c0_53] : memref<128x512xbf16, #tpu.memory_space<vmem>>, vector<128x512xbf16>
    %cst_54 = arith.constant dense<0.000000e+00> : vector<8x512xf32>
    %158 = tpu.matmul %156, %157, %cst_54 {dimension_numbers = #tpu.dot_dimension_numbers<[1], [0], [0], [1], [0, 0, 1, 1], [], []>} : vector<8x128xbf16>, vector<128x512xbf16>, vector<8x512xf32> -> vector<8x512xf32>
    %159 = arith.addf %155, %158 : vector<8x512xf32>
    %160 = vector.extract_strided_slice %159 {offsets = [0, 0], sizes = [8, 128], strides = [1, 1]} : vector<8x512xf32> to vector<8x128xf32>
    %161 = arith.negf %160 : vector<8x128xf32>
    %162 = math.exp %161 : vector<8x128xf32>
    %cst_55 = arith.constant 1.000000e+00 : f32
    %163 = vector.broadcast %cst_55 : f32 to vector<8x128xf32>
    %164 = arith.addf %163, %162 : vector<8x128xf32>
    %165 = arith.divf %163, %164 : vector<8x128xf32>
    %166 = vector.extract_strided_slice %159 {offsets = [0, 128], sizes = [8, 128], strides = [1, 1]} : vector<8x512xf32> to vector<8x128xf32>
    %167 = arith.negf %166 : vector<8x128xf32>
    %168 = math.exp %167 : vector<8x128xf32>
    %cst_56 = arith.constant 1.000000e+00 : f32
    %169 = vector.broadcast %cst_56 : f32 to vector<8x128xf32>
    %170 = arith.addf %169, %168 : vector<8x128xf32>
    %171 = arith.divf %169, %170 : vector<8x128xf32>
    %172 = vector.extract_strided_slice %159 {offsets = [0, 256], sizes = [8, 128], strides = [1, 1]} : vector<8x512xf32> to vector<8x128xf32>
    %173 = math.tanh %172 : vector<8x128xf32>
    %174 = vector.extract_strided_slice %159 {offsets = [0, 384], sizes = [8, 128], strides = [1, 1]} : vector<8x512xf32> to vector<8x128xf32>
    %175 = arith.negf %174 : vector<8x128xf32>
    %176 = math.exp %175 : vector<8x128xf32>
    %cst_57 = arith.constant 1.000000e+00 : f32
    %177 = vector.broadcast %cst_57 : f32 to vector<8x128xf32>
    %178 = arith.addf %177, %176 : vector<8x128xf32>
    %179 = arith.divf %177, %178 : vector<8x128xf32>
    %180 = arith.mulf %171, %149 : vector<8x128xf32>
    %181 = arith.mulf %165, %173 : vector<8x128xf32>
    %182 = arith.addf %180, %181 : vector<8x128xf32>
    %183 = math.tanh %182 : vector<8x128xf32>
    %184 = arith.mulf %179, %183 : vector<8x128xf32>
    %c5_i32 = arith.constant 5 : i32
    %c8_i32_58 = arith.constant 8 : i32
    %185 = arith.muli %c5_i32, %c8_i32_58 : i32
    %186 = tpu.assume_multiple %185, 8 : i32
    %187 = arith.index_cast %186 : i32 to index
    %c0_59 = arith.constant 0 : index
    %188 = vector.load %arg16[%187, %c0_59] : memref<64x512xf32, #tpu.memory_space<vmem>>, vector<8x512xf32>
    %189 = arith.truncf %184 : vector<8x128xf32> to vector<8x128xbf16>
    %c0_60 = arith.constant 0 : index
    %c0_61 = arith.constant 0 : index
    %190 = vector.load %arg7[%c0_60, %c0_61] : memref<128x512xbf16, #tpu.memory_space<vmem>>, vector<128x512xbf16>
    %cst_62 = arith.constant dense<0.000000e+00> : vector<8x512xf32>
    %191 = tpu.matmul %189, %190, %cst_62 {dimension_numbers = #tpu.dot_dimension_numbers<[1], [0], [0], [1], [0, 0, 1, 1], [], []>} : vector<8x128xbf16>, vector<128x512xbf16>, vector<8x512xf32> -> vector<8x512xf32>
    %192 = arith.addf %188, %191 : vector<8x512xf32>
    %193 = vector.extract_strided_slice %192 {offsets = [0, 0], sizes = [8, 128], strides = [1, 1]} : vector<8x512xf32> to vector<8x128xf32>
    %194 = arith.negf %193 : vector<8x128xf32>
    %195 = math.exp %194 : vector<8x128xf32>
    %cst_63 = arith.constant 1.000000e+00 : f32
    %196 = vector.broadcast %cst_63 : f32 to vector<8x128xf32>
    %197 = arith.addf %196, %195 : vector<8x128xf32>
    %198 = arith.divf %196, %197 : vector<8x128xf32>
    %199 = vector.extract_strided_slice %192 {offsets = [0, 128], sizes = [8, 128], strides = [1, 1]} : vector<8x512xf32> to vector<8x128xf32>
    %200 = arith.negf %199 : vector<8x128xf32>
    %201 = math.exp %200 : vector<8x128xf32>
    %cst_64 = arith.constant 1.000000e+00 : f32
    %202 = vector.broadcast %cst_64 : f32 to vector<8x128xf32>
    %203 = arith.addf %202, %201 : vector<8x128xf32>
    %204 = arith.divf %202, %203 : vector<8x128xf32>
    %205 = vector.extract_strided_slice %192 {offsets = [0, 256], sizes = [8, 128], strides = [1, 1]} : vector<8x512xf32> to vector<8x128xf32>
    %206 = math.tanh %205 : vector<8x128xf32>
    %207 = vector.extract_strided_slice %192 {offsets = [0, 384], sizes = [8, 128], strides = [1, 1]} : vector<8x512xf32> to vector<8x128xf32>
    %208 = arith.negf %207 : vector<8x128xf32>
    %209 = math.exp %208 : vector<8x128xf32>
    %cst_65 = arith.constant 1.000000e+00 : f32
    %210 = vector.broadcast %cst_65 : f32 to vector<8x128xf32>
    %211 = arith.addf %210, %209 : vector<8x128xf32>
    %212 = arith.divf %210, %211 : vector<8x128xf32>
    %213 = arith.mulf %204, %182 : vector<8x128xf32>
    %214 = arith.mulf %198, %206 : vector<8x128xf32>
    %215 = arith.addf %213, %214 : vector<8x128xf32>
    %216 = math.tanh %215 : vector<8x128xf32>
    %217 = arith.mulf %212, %216 : vector<8x128xf32>
    %c6_i32 = arith.constant 6 : i32
    %c8_i32_66 = arith.constant 8 : i32
    %218 = arith.muli %c6_i32, %c8_i32_66 : i32
    %219 = tpu.assume_multiple %218, 8 : i32
    %220 = arith.index_cast %219 : i32 to index
    %c0_67 = arith.constant 0 : index
    %221 = vector.load %arg16[%220, %c0_67] : memref<64x512xf32, #tpu.memory_space<vmem>>, vector<8x512xf32>
    %222 = arith.truncf %217 : vector<8x128xf32> to vector<8x128xbf16>
    %c0_68 = arith.constant 0 : index
    %c0_69 = arith.constant 0 : index
    %223 = vector.load %arg7[%c0_68, %c0_69] : memref<128x512xbf16, #tpu.memory_space<vmem>>, vector<128x512xbf16>
    %cst_70 = arith.constant dense<0.000000e+00> : vector<8x512xf32>
    %224 = tpu.matmul %222, %223, %cst_70 {dimension_numbers = #tpu.dot_dimension_numbers<[1], [0], [0], [1], [0, 0, 1, 1], [], []>} : vector<8x128xbf16>, vector<128x512xbf16>, vector<8x512xf32> -> vector<8x512xf32>
    %225 = arith.addf %221, %224 : vector<8x512xf32>
    %226 = vector.extract_strided_slice %225 {offsets = [0, 0], sizes = [8, 128], strides = [1, 1]} : vector<8x512xf32> to vector<8x128xf32>
    %227 = arith.negf %226 : vector<8x128xf32>
    %228 = math.exp %227 : vector<8x128xf32>
    %cst_71 = arith.constant 1.000000e+00 : f32
    %229 = vector.broadcast %cst_71 : f32 to vector<8x128xf32>
    %230 = arith.addf %229, %228 : vector<8x128xf32>
    %231 = arith.divf %229, %230 : vector<8x128xf32>
    %232 = vector.extract_strided_slice %225 {offsets = [0, 128], sizes = [8, 128], strides = [1, 1]} : vector<8x512xf32> to vector<8x128xf32>
    %233 = arith.negf %232 : vector<8x128xf32>
    %234 = math.exp %233 : vector<8x128xf32>
    %cst_72 = arith.constant 1.000000e+00 : f32
    %235 = vector.broadcast %cst_72 : f32 to vector<8x128xf32>
    %236 = arith.addf %235, %234 : vector<8x128xf32>
    %237 = arith.divf %235, %236 : vector<8x128xf32>
    %238 = vector.extract_strided_slice %225 {offsets = [0, 256], sizes = [8, 128], strides = [1, 1]} : vector<8x512xf32> to vector<8x128xf32>
    %239 = math.tanh %238 : vector<8x128xf32>
    %240 = vector.extract_strided_slice %225 {offsets = [0, 384], sizes = [8, 128], strides = [1, 1]} : vector<8x512xf32> to vector<8x128xf32>
    %241 = arith.negf %240 : vector<8x128xf32>
    %242 = math.exp %241 : vector<8x128xf32>
    %cst_73 = arith.constant 1.000000e+00 : f32
    %243 = vector.broadcast %cst_73 : f32 to vector<8x128xf32>
    %244 = arith.addf %243, %242 : vector<8x128xf32>
    %245 = arith.divf %243, %244 : vector<8x128xf32>
    %246 = arith.mulf %237, %215 : vector<8x128xf32>
    %247 = arith.mulf %231, %239 : vector<8x128xf32>
    %248 = arith.addf %246, %247 : vector<8x128xf32>
    %249 = math.tanh %248 : vector<8x128xf32>
    %250 = arith.mulf %245, %249 : vector<8x128xf32>
    %c7_i32 = arith.constant 7 : i32
    %c8_i32_74 = arith.constant 8 : i32
    %251 = arith.muli %c7_i32, %c8_i32_74 : i32
    %252 = tpu.assume_multiple %251, 8 : i32
    %253 = arith.index_cast %252 : i32 to index
    %c0_75 = arith.constant 0 : index
    %254 = vector.load %arg16[%253, %c0_75] : memref<64x512xf32, #tpu.memory_space<vmem>>, vector<8x512xf32>
    %255 = arith.truncf %250 : vector<8x128xf32> to vector<8x128xbf16>
    %c0_76 = arith.constant 0 : index
    %c0_77 = arith.constant 0 : index
    %256 = vector.load %arg7[%c0_76, %c0_77] : memref<128x512xbf16, #tpu.memory_space<vmem>>, vector<128x512xbf16>
    %cst_78 = arith.constant dense<0.000000e+00> : vector<8x512xf32>
    %257 = tpu.matmul %255, %256, %cst_78 {dimension_numbers = #tpu.dot_dimension_numbers<[1], [0], [0], [1], [0, 0, 1, 1], [], []>} : vector<8x128xbf16>, vector<128x512xbf16>, vector<8x512xf32> -> vector<8x512xf32>
    %258 = arith.addf %254, %257 : vector<8x512xf32>
    %259 = vector.extract_strided_slice %258 {offsets = [0, 0], sizes = [8, 128], strides = [1, 1]} : vector<8x512xf32> to vector<8x128xf32>
    %260 = arith.negf %259 : vector<8x128xf32>
    %261 = math.exp %260 : vector<8x128xf32>
    %cst_79 = arith.constant 1.000000e+00 : f32
    %262 = vector.broadcast %cst_79 : f32 to vector<8x128xf32>
    %263 = arith.addf %262, %261 : vector<8x128xf32>
    %264 = arith.divf %262, %263 : vector<8x128xf32>
    %265 = vector.extract_strided_slice %258 {offsets = [0, 128], sizes = [8, 128], strides = [1, 1]} : vector<8x512xf32> to vector<8x128xf32>
    %266 = arith.negf %265 : vector<8x128xf32>
    %267 = math.exp %266 : vector<8x128xf32>
    %cst_80 = arith.constant 1.000000e+00 : f32
    %268 = vector.broadcast %cst_80 : f32 to vector<8x128xf32>
    %269 = arith.addf %268, %267 : vector<8x128xf32>
    %270 = arith.divf %268, %269 : vector<8x128xf32>
    %271 = vector.extract_strided_slice %258 {offsets = [0, 256], sizes = [8, 128], strides = [1, 1]} : vector<8x512xf32> to vector<8x128xf32>
    %272 = math.tanh %271 : vector<8x128xf32>
    %273 = vector.extract_strided_slice %258 {offsets = [0, 384], sizes = [8, 128], strides = [1, 1]} : vector<8x512xf32> to vector<8x128xf32>
    %274 = arith.negf %273 : vector<8x128xf32>
    %275 = math.exp %274 : vector<8x128xf32>
    %cst_81 = arith.constant 1.000000e+00 : f32
    %276 = vector.broadcast %cst_81 : f32 to vector<8x128xf32>
    %277 = arith.addf %276, %275 : vector<8x128xf32>
    %278 = arith.divf %276, %277 : vector<8x128xf32>
    %279 = arith.mulf %270, %248 : vector<8x128xf32>
    %280 = arith.mulf %264, %272 : vector<8x128xf32>
    %281 = arith.addf %279, %280 : vector<8x128xf32>
    %282 = math.tanh %281 : vector<8x128xf32>
    %283 = arith.mulf %278, %282 : vector<8x128xf32>
    %c8_i32_82 = arith.constant 8 : i32
    %c0_83 = arith.constant 0 : index
    %c0_84 = arith.constant 0 : index
    %284 = vector.load %arg17[%c0_83, %c0_84] : memref<8x128xf32, #tpu.memory_space<vmem>>, vector<8x128xf32>
    tpu.vector_store %arg17[%c0_83, %c0_84], %283 {strides = array<i32>} : memref<8x128xf32, #tpu.memory_space<vmem>>, vector<8x128xf32>,
    %c0_85 = arith.constant 0 : index
    %c0_86 = arith.constant 0 : index
    %285 = vector.load %arg18[%c0_85, %c0_86] : memref<8x128xf32, #tpu.memory_space<vmem>>, vector<8x128xf32>
    tpu.vector_store %arg18[%c0_85, %c0_86], %281 {strides = array<i32>} : memref<8x128xf32, #tpu.memory_space<vmem>>, vector<8x128xf32>,
    %c0_i32_87 = arith.constant 0 : i32
    %286 = arith.cmpi eq, %arg0, %c0_i32_87 : i32
    %287 = arith.extui %286 : i1 to i32
    %c0_i32_88 = arith.constant 0 : i32
    %288 = arith.cmpi ne, %287, %c0_i32_88 : i32
    scf.if %288 {
      %289 = arith.truncf %283 : vector<8x128xf32> to vector<8x128xbf16>
      %c0_89 = arith.constant 0 : index
      %c0_90 = arith.constant 0 : index
      %290 = vector.load %arg9[%c0_89, %c0_90] : memref<128x256xbf16, #tpu.memory_space<vmem>>, vector<128x256xbf16>
      %cst_91 = arith.constant dense<0.000000e+00> : vector<8x256xf32>
      %291 = tpu.matmul %289, %290, %cst_91 {dimension_numbers = #tpu.dot_dimension_numbers<[1], [0], [0], [1], [0, 0, 1, 1], [], []>} : vector<8x128xbf16>, vector<128x256xbf16>, vector<8x256xf32> -> vector<8x256xf32>
      %c0_92 = arith.constant 0 : index
      %c0_93 = arith.constant 0 : index
      %292 = vector.load %arg10[%c0_92, %c0_93] : memref<1x256xf32, #tpu.memory_space<vmem>>, vector<1x256xf32>
      %293 = vector.broadcast %292 : vector<1x256xf32> to vector<8x256xf32>
      %294 = arith.addf %291, %293 : vector<8x256xf32>
      %cst_94 = arith.constant 0.000000e+00 : f32
      %295 = vector.broadcast %cst_94 : f32 to vector<8x256xf32>
      %296 = arith.maximumf %294, %295 : vector<8x256xf32>
      %297 = arith.truncf %296 : vector<8x256xf32> to vector<8x256xbf16>
      %c0_95 = arith.constant 0 : index
      %c0_96 = arith.constant 0 : index
      %298 = vector.load %arg11[%c0_95, %c0_96] : memref<256x128xbf16, #tpu.memory_space<vmem>>, vector<256x128xbf16>
      %cst_97 = arith.constant dense<0.000000e+00> : vector<8x128xf32>
      %299 = tpu.matmul %297, %298, %cst_97 {dimension_numbers = #tpu.dot_dimension_numbers<[1], [0], [0], [1], [0, 0, 1, 1], [], []>} : vector<8x256xbf16>, vector<256x128xbf16>, vector<8x128xf32> -> vector<8x128xf32>
      %c0_98 = arith.constant 0 : index
      %c0_99 = arith.constant 0 : index
      %300 = vector.load %arg12[%c0_98, %c0_99] : memref<1x128xf32, #tpu.memory_space<vmem>>, vector<1x128xf32>
      %301 = vector.broadcast %300 : vector<1x128xf32> to vector<8x128xf32>
      %302 = arith.addf %299, %301 : vector<8x128xf32>
      %c0_100 = arith.constant 0 : index
      %c0_101 = arith.constant 0 : index
      %303 = vector.load %arg13[%c0_100, %c0_101] : memref<8x128xf32, #tpu.memory_space<vmem>>, vector<8x128xf32>
      tpu.vector_store %arg13[%c0_100, %c0_101], %302 {strides = array<i32>} : memref<8x128xf32, #tpu.memory_space<vmem>>, vector<8x128xf32>,
      %c0_102 = arith.constant 0 : index
      %c0_103 = arith.constant 0 : index
      %304 = vector.load %arg14[%c0_102, %c0_103] : memref<8x128xf32, #tpu.memory_space<vmem>>, vector<8x128xf32>
      tpu.vector_store %arg14[%c0_102, %c0_103], %283 {strides = array<i32>} : memref<8x128xf32, #tpu.memory_space<vmem>>, vector<8x128xf32>,
      %c0_104 = arith.constant 0 : index
      %c0_105 = arith.constant 0 : index
      %305 = vector.load %arg15[%c0_104, %c0_105] : memref<8x128xf32, #tpu.memory_space<vmem>>, vector<8x128xf32>
      tpu.vector_store %arg15[%c0_104, %c0_105], %281 {strides = array<i32>} : memref<8x128xf32, #tpu.memory_space<vmem>>, vector<8x128xf32>,
    } else {
    }
    return
  }
  func.func @transform_0(%arg0: i32) -> (i32, i32) {
    %c0_i32 = arith.constant 0 : i32
    %c0_i32_0 = arith.constant 0 : i32
    return %arg0, %c0_i32 : i32, i32
  }
  func.func @transform_1(%arg0: i32) -> (i32, i32) {
    %c0_i32 = arith.constant 0 : i32
    %c0_i32_0 = arith.constant 0 : i32
    %c0_i32_1 = arith.constant 0 : i32
    return %c0_i32, %c0_i32_0 : i32, i32
  }
  func.func @transform_2(%arg0: i32) -> (i32, i32) {
    %c0_i32 = arith.constant 0 : i32
    %c0_i32_0 = arith.constant 0 : i32
    %c0_i32_1 = arith.constant 0 : i32
    return %c0_i32, %c0_i32_0 : i32, i32
  }
  func.func @transform_3(%arg0: i32) -> (i32, i32) {
    %c0_i32 = arith.constant 0 : i32
    %c0_i32_0 = arith.constant 0 : i32
    %c0_i32_1 = arith.constant 0 : i32
    return %c0_i32, %c0_i32_0 : i32, i32
  }
  func.func @transform_4(%arg0: i32) -> (i32, i32) {
    %c0_i32 = arith.constant 0 : i32
    %c0_i32_0 = arith.constant 0 : i32
    %c0_i32_1 = arith.constant 0 : i32
    return %c0_i32, %c0_i32_0 : i32, i32
  }
  func.func @transform_5(%arg0: i32) -> (i32, i32) {
    %c0_i32 = arith.constant 0 : i32
    %c0_i32_0 = arith.constant 0 : i32
    %c0_i32_1 = arith.constant 0 : i32
    return %c0_i32, %c0_i32_0 : i32, i32
  }
  func.func @transform_6(%arg0: i32) -> (i32, i32) {
    %c0_i32 = arith.constant 0 : i32
    %c0_i32_0 = arith.constant 0 : i32
    %c0_i32_1 = arith.constant 0 : i32
    return %c0_i32, %c0_i32_0 : i32, i32
  }
  func.func @transform_7(%arg0: i32) -> (i32, i32) {
    %c0_i32 = arith.constant 0 : i32
    %c0_i32_0 = arith.constant 0 : i32
    %c0_i32_1 = arith.constant 0 : i32
    return %c0_i32, %c0_i32_0 : i32, i32
  }
  func.func @transform_8(%arg0: i32) -> (i32, i32) {
    %c0_i32 = arith.constant 0 : i32
    %c0_i32_0 = arith.constant 0 : i32
    %c0_i32_1 = arith.constant 0 : i32
    return %c0_i32, %c0_i32_0 : i32, i32
  }
  func.func @transform_9(%arg0: i32) -> (i32, i32) {
    %c0_i32 = arith.constant 0 : i32
    %c0_i32_0 = arith.constant 0 : i32
    %c0_i32_1 = arith.constant 0 : i32
    return %c0_i32, %c0_i32_0 : i32, i32
  }
  func.func @transform_10(%arg0: i32) -> (i32, i32) {
    %c0_i32 = arith.constant 0 : i32
    %c0_i32_0 = arith.constant 0 : i32
    %c0_i32_1 = arith.constant 0 : i32
    return %c0_i32, %c0_i32_0 : i32, i32
  }
  func.func @transform_11(%arg0: i32) -> (i32, i32) {
    %c0_i32 = arith.constant 0 : i32
    %c0_i32_0 = arith.constant 0 : i32
    %c0_i32_1 = arith.constant 0 : i32
    return %c0_i32, %c0_i32_0 : i32, i32
  }
  func.func @transform_12(%arg0: i32) -> (i32, i32) {
    %c0_i32 = arith.constant 0 : i32
    %c0_i32_0 = arith.constant 0 : i32
    %c0_i32_1 = arith.constant 0 : i32
    return %c0_i32, %c0_i32_0 : i32, i32
  }
  func.func @transform_13(%arg0: i32) -> (i32, i32) {
    %c0_i32 = arith.constant 0 : i32
    %c0_i32_0 = arith.constant 0 : i32
    %c0_i32_1 = arith.constant 0 : i32
    return %c0_i32, %c0_i32_0 : i32, i32
  }
  func.func @transform_14(%arg0: i32) -> (i32, i32) {
    %c0_i32 = arith.constant 0 : i32
    %c0_i32_0 = arith.constant 0 : i32
    %c0_i32_1 = arith.constant 0 : i32
    return %c0_i32, %c0_i32_0 : i32, i32
  }
}

</mosaic_0001>

<bundles_post_ra>
// kernel: tpu_custom_call.1
= control target key start
LH: loop header
LB: loop body
LE: loop exit
PB: predicated region body
PF: predicated region fallthrough
CT: control target
= control target key end

     0   :  { %20 = vsyncpa [#allocation6], 0  ;;  %s3494_s0 = inlined_call_operand.vmem [shape: bf16[64,32], index: 0, kind: input, shape index: {}]   ;;  %s3495_s1 = inlined_call_operand.vmem [shape: f32[8,128], index: 1, kind: input, shape index: {}]   ;;  %s3496_s2 = inlined_call_operand.vmem [shape: f32[8,128], index: 2, kind: input, shape index: {}]   ;;  %s3497_s3 = inlined_call_operand.vmem [shape: bf16[32,128], index: 3, kind: input, shape index: {}]   ;;  %s3498_s4 = inlined_call_operand.vmem [shape: f32[1,128], index: 4, kind: input, shape index: {}]   ;;  %s3499_s5 = inlined_call_operand.hbm [shape: bf16[128,512], index: 5, kind: input, shape index: {}]   ;;  %s3500_s6 = inlined_call_operand.hbm [shape: bf16[128,512], index: 6, kind: input, shape index: {}]   ;;  %s3501_s7 = inlined_call_operand.vmem [shape: f32[1,512], index: 7, kind: input, shape index: {}]   ;;  %s3502_s8 = inlined_call_operand.hbm [shape: bf16[128,256], index: 8, kind: input, shape index: {}]   ;;  %s3503_s9 = inlined_call_operand.vmem [shape: f32[1,256], index: 9, kind: input, shape index: {}]   ;;  %s3504_s10 = inlined_call_operand.hbm [shape: bf16[256,128], index: 10, kind: input, shape index: {}]   ;;  %s3505_s11 = inlined_call_operand.vmem [shape: f32[1,128], index: 11, kind: input, shape index: {}]   ;;  %s3506_s12 = inlined_call_operand.hbm [shape: f32[8,128], index: 12, kind: output, shape index: {0}]   ;;  %s3507_s13 = inlined_call_operand.hbm [shape: f32[8,128], index: 13, kind: output, shape index: {1}]   ;;  %s3508_s14 = inlined_call_operand.hbm [shape: f32[8,128], index: 14, kind: output, shape index: {2}]  }
   0x1   :  { %21 = vsyncpa [#allocation9], 0 }
   0x2   :  { %22 = vsyncpa [#allocation12], 0 }
   0x3   :  { %23 = vsyncpa [#allocation7], 0 }
   0x4   :  { %24 = vsyncpa [#allocation15], 0  ;;  %s2807_s29 = smov [#allocation8]   ;;  %s2808_s15 = smov [#allocation5]  }
   0x5   :  { %s52_s30 = sshll.u32 %s2807_s29, 4  ;;  %s40_s16 = sshll.u32 %s2808_s15, 4  ;;  %s53_s30 = int_to_ptr.vmem [resolvable:$true] %s52_s30  ;;  %s41_s16 = int_to_ptr.vmem [resolvable:$true] %s40_s16 }
   0x6   :  { %s2665_s17 = scalar_lea.vmem %s53_s30, 4096  ;;  %p2670_p1 = scmp.lt.s32.totalorder %s53_s30, %s53_s30 }
   0x7   :  { %p2666_p0 = scmp.ne.s32.totalorder %s53_s30, %s2665_s17  ;;  %p2671_p2 = scmp.lt.s32.totalorder %s2665_s17, %s2665_s17 }
   0x9   :  { %p2672_p3 = por %p2671_p2, %p2670_p1 }
   0xb   :  { %p2673_p4 = pnand %p2672_p3, %p2666_p0 }
   0xd   :  { %2676 = shalt.err (!%p2673_p4)
}
   0xe   :  { %s2809_s18 = smov 256   ;;  %s2810_s19 = smov 16  }
   0xf   :  { %58 = dma.hbm_to_vmem [thread:$0]  %s3500_s6, 4096, %s53_s30, [#allocation9], %s2809_s18, %s2809_s18, %s2810_s19  }
  0x10   :  { %s2685_s22 = scalar_lea.vmem %s41_s16, 4096  ;;  %p2690_p6 = scmp.lt.s32.totalorder %s41_s16, %s41_s16 }
  0x11   :  { %p2686_p5 = scmp.ne.s32.totalorder %s41_s16, %s2685_s22  ;;  %p2691_p7 = scmp.lt.s32.totalorder %s2685_s22, %s2685_s22 }
  0x13   :  { %p2692_p8 = por %p2691_p7, %p2690_p6 }
  0x15   :  { %p2693_p9 = pnand %p2692_p8, %p2686_p5 }
  0x17   :  { %2696 = shalt.err (!%p2693_p9)
}
  0x18   :  { %46 = dma.hbm_to_vmem [thread:$0]  %s3499_s5, 4096, %s41_s16, [#allocation6], %s2809_s18, %s2809_s18, %s2810_s19  }
  0x19   :  { %s2811_s25 = smov [#allocation10]  }
  0x1a   :  { %s66_s26 = sshll.u32 %s2811_s25, 4  ;;  %s67_s26 = int_to_ptr.vmem [resolvable:$true] %s66_s26 }
  0x1b   :  { %s2705_s27 = scalar_lea.vmem %s67_s26, 2048  ;;  %p2710_p11 = scmp.lt.s32.totalorder %s67_s26, %s67_s26 }
  0x1c   :  { %p2706_p10 = scmp.ne.s32.totalorder %s67_s26, %s2705_s27  ;;  %p2711_p12 = scmp.lt.s32.totalorder %s2705_s27, %s2705_s27 }
  0x1e   :  { %p2712_p13 = por %p2711_p12, %p2710_p11 }
  0x20   :  { %p2713_p0 = pnand %p2712_p13, %p2706_p10 }
  0x22   :  { %2716 = shalt.err (!%p2713_p0)
}
  0x23   :  { %s2812_s6 = smov 128   ;;  %s2813_s28 = smov 8  }
  0x24   :  { %72 = dma.hbm_to_vmem [thread:$0]  %s3502_s8, 2048, %s67_s26, [#allocation9], %s2812_s6, %s2812_s6, %s2813_s28  }
  0x25   :  { %s2814_s15 = smov [#allocation11]  }
  0x26   :  { %s80_s17 = sshll.u32 %s2814_s15, 4  ;;  %s81_s17 = int_to_ptr.vmem [resolvable:$true] %s80_s17 }
  0x27   :  { %s2725_s5 = scalar_lea.vmem %s81_s17, 2048  ;;  %p2730_p2 = scmp.lt.s32.totalorder %s81_s17, %s81_s17 }
  0x28   :  { %p2726_p1 = scmp.ne.s32.totalorder %s81_s17, %s2725_s5  ;;  %p2731_p3 = scmp.lt.s32.totalorder %s2725_s5, %s2725_s5 }
  0x2a   :  { %p2732_p4 = por %p2731_p3, %p2730_p2 }
  0x2c   :  { %p2733_p5 = pnand %p2732_p4, %p2726_p1 }
  0x2e   :  { %2736 = shalt.err (!%p2733_p5)
}
  0x2f   :  { %s2815_s16 = smov 64   ;;  %s2816_s18 = smov 4  }
  0x30   :  { %86 = dma.hbm_to_vmem [thread:$0]  %s3504_s10, 2048, %s81_s17, [#allocation12], %s2815_s16, %s2815_s16, %s2816_s18  }
  0x31   :  { %2797 = dma.done.wait [#allocation6], 4096  }
  0x32   :  { %2798 = vsyncadd [#allocation6], 4294963200 }
  0x33   :  { %2799 = dma.done.wait [#allocation9], 6144  }
  0x34   :  { %2800 = vsyncadd [#allocation9], 4294961152 }
  0x35   :  { %2801 = dma.done.wait [#allocation12], 2048  }
  0x36   :  { %2802 = vsyncadd [#allocation12], 4294965248  ;;  %v2355_v0 = vld [vmem:[%s3497_s3 + $0x8] sm:$0xff]   ;;  %v2356_v1 = vld [vmem:[%s3497_s3] sm:$0xff]   ;;  %vm161_vm0 = vcmask 261120   ;;  %v3511_v40 = vmov 0  }
  0x37   :  { %2329 = vmatprep.subr.bf16.mxu0 %v2355_v0  ;;  %v2357_v2 = vld [vmem:[%s3494_s0] sm:$0xff]   ;;  %v2358_v3 = vld [vmem:[%s3494_s0 + $0x8] sm:$0xff]   ;;  %v2359_v4 = vld [vmem:[%s3494_s0 + $0x10] sm:$0xff]   ;;  %497 = vmatprep.mubr.bf16.mxu1 %v3511_v40  ;;  %s2818_s16 = smov [#allocation14]  }
  0x38   :  { %2330 = vmatpush3.bf16.msra.mxu0 %v2355_v0  ;;  %2333 = vmatprep.mubr.msk.bf16.mxu0 %vm161_vm0, %v2357_v2  ;;  %v2361_v5 = vld [vmem:[#allocation5 + $0xe4] ss:$16 sps:$4 sm:$0xff]   ;;  %v2363_v6 = vld [vmem:[#allocation5 + $0xe0] ss:$16 sps:$4 sm:$0xff]   ;;  %v2364_v7 = vld [vmem:[#allocation5 + $0xe8] ss:$16 sps:$4 sm:$0xff]  }
  0x39   :  { %2331 = vmatprep.subr.bf16.mxu0 %v2356_v1  ;;  %465 = vmatprep.subr.bf16.mxu1 %v2361_v5  ;;  %v2366_v8 = vld [vmem:[#allocation5 + $0xec] ss:$16 sps:$4 sm:$0xff]   ;;  %v2367_v9 = vld [vmem:[#allocation5 + $0xc4] ss:$16 sps:$4 sm:$0xff]   ;;  %v2369_v10 = vld [vmem:[#allocation5 + $0xc0] ss:$16 sps:$4 sm:$0xff]  }
  0x3a   :  { %466 = vmatpush1.bf16.msra.mxu1 %v2363_v6  ;;  %v2370_v11 = vld [vmem:[#allocation5 + $0xc8] ss:$16 sps:$4 sm:$0xff]   ;;  %v2372_v12 = vld [vmem:[#allocation5 + $0xcc] ss:$16 sps:$4 sm:$0xff]   ;;  %v2373_v14 = vld [vmem:[#allocation5 + $0xa4] ss:$16 sps:$4 sm:$0xff]  }
  0x3b   :  { %v2360_v13 = vld [vmem:[%s3494_s0 + $0x18] sm:$0xff]   ;;  %467 = vmatprep.subr.bf16.mxu1 %v2367_v9  ;;  %v2375_v15 = vld [vmem:[#allocation5 + $0xa0] ss:$16 sps:$4 sm:$0xff]   ;;  %v2379_v17 = vld [vmem:[#allocation5 + $0x84] ss:$16 sps:$4 sm:$0xff]  }
  0x3c   :  { %2332 = vmatpush3.bf16.msra.mxu0 %v2356_v1  ;;  %v2378_v16 = vld [vmem:[#allocation5 + $0xac] ss:$16 sps:$4 sm:$0xff]   ;;  %v2376_v18 = vld [vmem:[#allocation5 + $0xa8] ss:$16 sps:$4 sm:$0xff]   ;;  %v2381_v20 = vld [vmem:[#allocation5 + $0x80] ss:$16 sps:$4 sm:$0xff]  }
  0x3d   :  { %538 = vmatprep.subr.bf16.mxu0 %v2366_v8  ;;  %v2384_v19 = vld [vmem:[#allocation5 + $0x8c] ss:$16 sps:$4 sm:$0xff]   ;;  %v2382_v21 = vld [vmem:[#allocation5 + $0x88] ss:$16 sps:$4 sm:$0xff]   ;;  %v2385_v22 = vld [vmem:[#allocation5 + $0x64] ss:$16 sps:$4 sm:$0xff]  }
  0x3e   :  { %468 = vmatpush1.bf16.msra.mxu1 %v2369_v10  ;;  %v2387_v23 = vld [vmem:[#allocation5 + $0x60] ss:$16 sps:$4 sm:$0xff]   ;;  %v2390_v24 = vld [vmem:[#allocation5 + $0x6c] ss:$16 sps:$4 sm:$0xff]   ;;  %v2388_v25 = vld [vmem:[#allocation5 + $0x68] ss:$16 sps:$4 sm:$0xff]  }
  0x3f   :  { %2334 = vmatmul.mubr.msk.bf16.vlgmr.msra.gmra.mxu0 %vm161_vm0, %v2358_v3  ;;  %469 = vmatprep.subr.bf16.mxu1 %v2373_v14  ;;  %v2391_v26 = vld [vmem:[#allocation5 + $0x44] ss:$16 sps:$4 sm:$0xff]   ;;  %v2396_v27 = vld [vmem:[#allocation5 + $0x4c] ss:$16 sps:$4 sm:$0xff]   ;;  %v2393_v28 = vld [vmem:[#allocation5 + $0x40] ss:$16 sps:$4 sm:$0xff]  }
  0x40   :  { %2337 = vmatprep.mubr.msk.bf16.mxu0 %vm161_vm0, %v2359_v4  ;;  %539 = vmatpush1.bf16.msra.mxu0 %v2364_v7  ;;  %v2394_v29 = vld [vmem:[#allocation5 + $0x48] ss:$16 sps:$4 sm:$0xff]   ;;  %v2397_v30 = vld [vmem:[#allocation5 + $0x24] ss:$16 sps:$4 sm:$0xff]   ;;  %v2402_v31 = vld [vmem:[#allocation5 + $0x2c] ss:$16 sps:$4 sm:$0xff]  }
  0x41   :  { %540 = vmatprep.subr.bf16.mxu0 %v2372_v12  ;;  %v2399_v32 = vld [vmem:[#allocation5 + $0x20] ss:$16 sps:$4 sm:$0xff]   ;;  %v2400_v33 = vld [vmem:[#allocation5 + $0x28] ss:$16 sps:$4 sm:$0xff]   ;;  %v2403_v34 = vld [vmem:[#allocation5 + $0x4] ss:$16 sps:$4 sm:$0xff]  }
  0x42   :  { %470 = vmatpush1.bf16.msra.mxu1 %v2375_v15  ;;  %v2408_v35 = vld [vmem:[#allocation5 + $0xc] ss:$16 sps:$4 sm:$0xff]   ;;  %v2405_v36 = vld [vmem:[#allocation5] ss:$16 sps:$4 sm:$0xff]   ;;  %v2406_v37 = vld [vmem:[#allocation5 + $0x8] ss:$16 sps:$4 sm:$0xff]  }
  0x43   :  { %471 = vmatprep.subr.bf16.mxu1 %v2379_v17  ;;  %v2930_v38 = vld [vmem:[#allocation8 + $0xe4] ss:$16 sps:$4 sm:$0xff]   ;;  %v2932_v39 = vld [vmem:[#allocation8 + $0xec] ss:$16 sps:$4 sm:$0xff]   ;;  %v2169_v43 = vld [vmem:[%s3498_s4] ss:$0 sm:$0xff] }
  0x44   :  { %541 = vmatpush1.bf16.msra.mxu0 %v2370_v11  ;;  %v2941_v52 = vld [vmem:[#allocation8 + $0xe0] ss:$16 sps:$4 sm:$0xff]   ;;  %v2943_v53 = vld [vmem:[#allocation8 + $0xe8] ss:$16 sps:$4 sm:$0xff]   ;;  %v2945_v56 = vld [vmem:[#allocation8 + $0xc4] ss:$16 sps:$4 sm:$0xff]  }
  0x45   :  { %542 = vmatprep.subr.bf16.mxu0 %v2378_v16  ;;  %v2947_v57 = vld [vmem:[#allocation8 + $0xcc] ss:$16 sps:$4 sm:$0xff]   ;;  %v2951_v60 = vld [vmem:[#allocation8 + $0xc0] ss:$16 sps:$4 sm:$0xff]   ;;  %v2953_v61 = vld [vmem:[#allocation8 + $0xc8] ss:$16 sps:$4 sm:$0xff]  }
  0x46   :  { %472 = vmatpush1.bf16.msra.mxu1 %v2381_v20  ;;  %v2957_v63 = vld [vmem:[#allocation8 + $0xa4] ss:$16 sps:$4 sm:$0xff]   ;;  %v2959_v0 = vld [vmem:[#allocation8 + $0xac] ss:$16 sps:$4 sm:$0xff]   ;;  %v2965_v3 = vld [vmem:[#allocation8 + $0xa0] ss:$16 sps:$4 sm:$0xff]  }
  0x47   :  { %2338 = vmatmul.mubr.msk.bf16.gmra.mxu0 %vm161_vm0, %v2360_v13  ;;  %473 = vmatprep.subr.bf16.mxu1 %v2385_v22  ;;  %v2967_v4 = vld [vmem:[#allocation8 + $0xa8] ss:$16 sps:$4 sm:$0xff]   ;;  %v2971_v8 = vld [vmem:[#allocation8 + $0x84] ss:$16 sps:$4 sm:$0xff]   ;;  %v2973_v9 = vld [vmem:[#allocation8 + $0x8c] ss:$16 sps:$4 sm:$0xff]  }
  0x48   :  { %543 = vmatpush1.bf16.msra.mxu0 %v2376_v18  ;;  %570 = vmatprep.mubr.bf16.mxu0 %v3511_v40  ;;  %v2977_v10 = vld [vmem:[#allocation8 + $0x80] ss:$16 sps:$4 sm:$0xff]   ;;  %v2979_v11 = vld [vmem:[#allocation8 + $0x88] ss:$16 sps:$4 sm:$0xff]   ;;  %v2983_v14 = vld [vmem:[#allocation8 + $0x64] ss:$16 sps:$4 sm:$0xff]  }
  0x49   :  { %544 = vmatprep.subr.bf16.mxu0 %v2384_v19  ;;  %v2985_v15 = vld [vmem:[#allocation8 + $0x6c] ss:$16 sps:$4 sm:$0xff]   ;;  %v2991_v16 = vld [vmem:[#allocation8 + $0x60] ss:$16 sps:$4 sm:$0xff]   ;;  %v2993_v17 = vld [vmem:[#allocation8 + $0x68] ss:$16 sps:$4 sm:$0xff]  }
  0x4a   :  { %474 = vmatpush1.bf16.msra.mxu1 %v2387_v23  ;;  %v2999_v22 = vld [vmem:[#allocation8 + $0x4c] ss:$16 sps:$4 sm:$0xff]   ;;  %v3003_v23 = vld [vmem:[#allocation8 + $0x40] ss:$16 sps:$4 sm:$0xff]  }
  0x4b   :  { %475 = vmatprep.subr.bf16.mxu1 %v2391_v26 }
  0x4c   :  { %545 = vmatpush1.bf16.msra.mxu0 %v2382_v21  ;;  %v2997_v21 = vld [vmem:[#allocation8 + $0x44] ss:$16 sps:$4 sm:$0xff]  }
  0x4d   :  { %546 = vmatprep.subr.bf16.mxu0 %v2390_v24  ;;  %v3005_v24 = vld [vmem:[#allocation8 + $0x48] ss:$16 sps:$4 sm:$0xff]  }
  0x4e   :  { %476 = vmatpush1.bf16.msra.mxu1 %v2393_v28  ;;  %v3011_v28 = vld [vmem:[#allocation8 + $0x2c] ss:$16 sps:$4 sm:$0xff]  }
  0x4f   :  { %477 = vmatprep.subr.bf16.mxu1 %v2397_v30  ;;  %v3019_v30 = vld [vmem:[#allocation8 + $0x28] ss:$16 sps:$4 sm:$0xff]  }
  0x50   :  { %547 = vmatpush1.bf16.msra.mxu0 %v2388_v25 }
  0x51   :  { %548 = vmatprep.subr.bf16.mxu0 %v2396_v27  ;;  %v3009_v27 = vld [vmem:[#allocation8 + $0x24] ss:$16 sps:$4 sm:$0xff]  }
  0x52   :  { %478 = vmatpush1.bf16.msra.mxu1 %v2399_v32  ;;  %v3023_v32 = vld [vmem:[#allocation8 + $0x4] ss:$16 sps:$4 sm:$0xff]  }
  0x53   :  { %479 = vmatprep.subr.bf16.mxu1 %v2403_v34  ;;  %v3029_v34 = vld [vmem:[#allocation8] ss:$16 sps:$4 sm:$0xff]  }
  0x54   :  { %549 = vmatpush1.bf16.msra.mxu0 %v2394_v29  ;;  %v3017_v29 = vld [vmem:[#allocation8 + $0x20] ss:$16 sps:$4 sm:$0xff]  }
  0x55   :  { %550 = vmatprep.subr.bf16.mxu0 %v2402_v31 }
  0x56   :  { %480 = vmatpush1.bf16.msra.mxu1 %v2405_v36  ;;  %v106_v36 = vld [vmem:[%s3495_s1] sm:$0xff] }
  0x57   :  { %845 = vmatprep.subr.bf16.mxu1 %v2930_v38 }
  0x58   :  { %551 = vmatpush1.bf16.msra.mxu0 %v2400_v33  ;;  %v3025_v33 = vld [vmem:[#allocation8 + $0xc] ss:$16 sps:$4 sm:$0xff]  }
  0x59   :  { %552 = vmatprep.subr.bf16.mxu0 %v2408_v35  ;;  %v3031_v35 = vld [vmem:[#allocation8 + $0x8] ss:$16 sps:$4 sm:$0xff]  }
  0x5c   :  { %553 = vmatpush1.bf16.msra.mxu0 %v2406_v37  ;;  %v652_v37 = vpack.c.bf16 %v106_v36, %v106_v36 }
  0x5d   :  { %886 = vmatprep.subr.bf16.mxu0 %v2932_v39 }
  0xff   :  { %v2335_v41 = vpop.f32.mrf.mxu0 }
 0x100   :  { %v217_v59 = vadd.f32 %v2335_v41, %v2169_v43  ;;  %v285_v41 = vlaneseq }
 0x101   :  { %v208_v42 = vpop.f32.mrf.mxu0 }
 0x102   :  { %v209_v45 = vadd.f32 %v2169_v43, %v208_v42  ;;  %v241_v2 = vmax.f32 %v217_v59, 0.0  ;;  %v3078_v42 = vshrl.u32 %v285_v41, 7 }
 0x103   :  { %v2336_v44 = vpop.f32.mrf.mxu0 }
 0x104   :  { %v239_v49 = vmax.f32 %v209_v45, 0.0  ;;  %v220_v54 = vadd.f32 %v2336_v44, %v2169_v43  ;;  %3515 = vst [vmem:[#allocation22_spill] sm:$0xff] %v3078_v42  ;;  %v295_v44 = vsub.s32 2, %v3078_v42  ;;  %v283_v45 = vld [vmem:[%s3501_s7] sm:$0xf] }
 0x105   :  { %v211_v46 = vpop.f32.mrf.mxu0 }
 0x106   :  { %v212_v47 = vadd.f32 %v2169_v43, %v211_v46  ;;  %v242_v62 = vmax.f32 %v220_v54, 0.0 }
 0x107   :  { %v2339_v48 = vpop.f32.mrf.mxu0 }
 0x108   :  { %v240_v50 = vmax.f32 %v212_v47, 0.0  ;;  %v248_v5 = vpack.c.bf16 %v242_v62, %v241_v2  ;;  %v233_v18 = vadd.f32 %v2339_v48, %v2169_v43  ;;  %v3509_v48 = vsub.s32 1, %v3078_v42 }
 0x109   :  { %v224_v51 = vpop.f32.mrf.mxu0 }
 0x10a   :  { %v247_v55 = vpack.c.bf16 %v240_v50, %v239_v49  ;;  %v225_v6 = vadd.f32 %v2169_v43, %v224_v51  ;;  %v245_v25 = vmax.f32 %v233_v18, 0.0  ;;  %v299_v49 = vsub.s32 3, %v3078_v42 }
 0x10b   :  { %v2340_v58 = vpop.f32.mrf.mxu0  ;;  %v292_v62 = vrot.slane %v283_v45, %v3509_v48 }
 0x10c   :  { %498 = vmatmul.mubr.bf16.vlgmr.msra.gmra.mxu1 %v247_v55  ;;  %571 = vmatmul.mubr.bf16.vlgmr.msra.gmra.mxu0 %v247_v55  ;;  %v243_v12 = vmax.f32 %v225_v6, 0.0  ;;  %v236_v19 = vadd.f32 %v2340_v58, %v2169_v43  ;;  %v3097_v55 = vrot.slane %v283_v45, %v295_v44 }
 0x10d   :  { %846 = vmatpush1.bf16.msra.mxu1 %v2941_v52  ;;  %887 = vmatpush1.bf16.msra.mxu0 %v2943_v53  ;;  %v227_v1 = vpop.f32.mrf.mxu0 }
 0x10e   :  { %847 = vmatprep.subr.bf16.mxu1 %v2945_v56  ;;  %888 = vmatprep.subr.bf16.mxu0 %v2947_v57  ;;  %v228_v7 = vadd.f32 %v2169_v43, %v227_v1  ;;  %v246_v26 = vmax.f32 %v236_v19, 0.0  ;;  %v3510_v43 = vsub.s32 0, %v3078_v42  ;;  %v3101_v1 = vrot.slane %v283_v45, %v299_v49 }
 0x10f   :  { %507 = vmatprep.mubr.bf16.mxu1 %v3511_v40  ;;  %580 = vmatprep.mubr.bf16.mxu0 %v3511_v40 }
 0x110   :  { %v244_v13 = vmax.f32 %v228_v7, 0.0  ;;  %v250_v31 = vpack.c.bf16 %v246_v26, %v245_v25  ;;  %v288_v54 = vrot.slane %v283_v45, %v3510_v43 }
 0x111   :  { %848 = vmatpush1.bf16.msra.mxu1 %v2951_v60  ;;  %889 = vmatpush1.bf16.msra.mxu0 %v2953_v61 }
 0x112   :  { %849 = vmatprep.subr.bf16.mxu1 %v2957_v63  ;;  %890 = vmatprep.subr.bf16.mxu0 %v2959_v0  ;;  %v249_v20 = vpack.c.bf16 %v244_v13, %v243_v12 }
 0x114   :  { %508 = vmatmul.mubr.bf16.gmra.mxu1 %v248_v5  ;;  %581 = vmatmul.mubr.bf16.gmra.mxu0 %v248_v5 }
 0x115   :  { %850 = vmatpush1.bf16.msra.mxu1 %v2965_v3  ;;  %891 = vmatpush1.bf16.msra.mxu0 %v2967_v4 }
 0x116   :  { %851 = vmatprep.subr.bf16.mxu1 %v2971_v8  ;;  %892 = vmatprep.subr.bf16.mxu0 %v2973_v9 }
 0x117   :  { %517 = vmatprep.mubr.bf16.mxu1 %v3511_v40  ;;  %590 = vmatprep.mubr.bf16.mxu0 %v3511_v40 }
 0x119   :  { %852 = vmatpush1.bf16.msra.mxu1 %v2977_v10  ;;  %893 = vmatpush1.bf16.msra.mxu0 %v2979_v11 }
 0x11a   :  { %853 = vmatprep.subr.bf16.mxu1 %v2983_v14  ;;  %894 = vmatprep.subr.bf16.mxu0 %v2985_v15 }
 0x11c   :  { %518 = vmatmul.mubr.bf16.gmra.mxu1 %v249_v20  ;;  %591 = vmatmul.mubr.bf16.gmra.mxu0 %v249_v20 }
 0x11d   :  { %854 = vmatpush1.bf16.msra.mxu1 %v2991_v16  ;;  %895 = vmatpush1.bf16.msra.mxu0 %v2993_v17 }
 0x11e   :  { %855 = vmatprep.subr.bf16.mxu1 %v2997_v21  ;;  %896 = vmatprep.subr.bf16.mxu0 %v2999_v22 }
 0x11f   :  { %527 = vmatprep.mubr.bf16.mxu1 %v3511_v40  ;;  %600 = vmatprep.mubr.bf16.mxu0 %v3511_v40 }
 0x121   :  { %856 = vmatpush1.bf16.msra.mxu1 %v3003_v23  ;;  %897 = vmatpush1.bf16.msra.mxu0 %v3005_v24 }
 0x122   :  { %857 = vmatprep.subr.bf16.mxu1 %v3009_v27  ;;  %898 = vmatprep.subr.bf16.mxu0 %v3011_v28 }
 0x124   :  { %528 = vmatmul.mubr.bf16.gmra.mxu1 %v250_v31  ;;  %601 = vmatmul.mubr.bf16.gmra.mxu0 %v250_v31 }
 0x125   :  { %858 = vmatpush1.bf16.msra.mxu1 %v3017_v29  ;;  %899 = vmatpush1.bf16.msra.mxu0 %v3019_v30 }
 0x126   :  { %859 = vmatprep.subr.bf16.mxu1 %v3023_v32  ;;  %900 = vmatprep.subr.bf16.mxu0 %v3025_v33 }
 0x127   :  { %877 = vmatprep.mubr.bf16.mxu1 %v3511_v40  ;;  %918 = vmatprep.mubr.bf16.mxu0 %v3511_v40 }
 0x129   :  { %860 = vmatpush1.bf16.msra.mxu1 %v3029_v34  ;;  %901 = vmatpush1.bf16.msra.mxu0 %v3031_v35 }
 0x12a   :  { %963 = vmatprep.subr.bf16.mxu1 %v2930_v38  ;;  %1004 = vmatprep.subr.bf16.mxu0 %v2932_v39 }
 0x12c   :  { %878 = vmatmul.mubr.bf16.vlgmr.msra.gmra.mxu1 %v652_v37  ;;  %919 = vmatmul.mubr.bf16.vlgmr.msra.gmra.mxu0 %v652_v37 }
 0x12d   :  { %964 = vmatpush1.bf16.msra.mxu1 %v2941_v52  ;;  %1005 = vmatpush1.bf16.msra.mxu0 %v2943_v53 }
 0x12e   :  { %965 = vmatprep.subr.bf16.mxu1 %v2945_v56  ;;  %1006 = vmatprep.subr.bf16.mxu0 %v2947_v57 }
 0x12f   :  { %995 = vmatprep.mubr.bf16.mxu1 %v3511_v40  ;;  %1036 = vmatprep.mubr.bf16.mxu0 %v3511_v40 }
 0x131   :  { %966 = vmatpush1.bf16.msra.mxu1 %v2951_v60  ;;  %1007 = vmatpush1.bf16.msra.mxu0 %v2953_v61 }
 0x132   :  { %967 = vmatprep.subr.bf16.mxu1 %v2957_v63  ;;  %1008 = vmatprep.subr.bf16.mxu0 %v2959_v0 }
 0x135   :  { %968 = vmatpush1.bf16.msra.mxu1 %v2965_v3  ;;  %1009 = vmatpush1.bf16.msra.mxu0 %v2967_v4 }
 0x136   :  { %969 = vmatprep.subr.bf16.mxu1 %v2971_v8  ;;  %1010 = vmatprep.subr.bf16.mxu0 %v2973_v9 }
 0x139   :  { %970 = vmatpush1.bf16.msra.mxu1 %v2977_v10  ;;  %1011 = vmatpush1.bf16.msra.mxu0 %v2979_v11 }
 0x13a   :  { %971 = vmatprep.subr.bf16.mxu1 %v2983_v14  ;;  %1012 = vmatprep.subr.bf16.mxu0 %v2985_v15 }
 0x13d   :  { %972 = vmatpush1.bf16.msra.mxu1 %v2991_v16  ;;  %1013 = vmatpush1.bf16.msra.mxu0 %v2993_v17 }
 0x13e   :  { %973 = vmatprep.subr.bf16.mxu1 %v2997_v21  ;;  %1014 = vmatprep.subr.bf16.mxu0 %v2999_v22 }
 0x141   :  { %974 = vmatpush1.bf16.msra.mxu1 %v3003_v23  ;;  %1015 = vmatpush1.bf16.msra.mxu0 %v3005_v24 }
 0x142   :  { %975 = vmatprep.subr.bf16.mxu1 %v3009_v27  ;;  %1016 = vmatprep.subr.bf16.mxu0 %v3011_v28 }
 0x145   :  { %976 = vmatpush1.bf16.msra.mxu1 %v3017_v29  ;;  %1017 = vmatpush1.bf16.msra.mxu0 %v3019_v30 }
 0x146   :  { %977 = vmatprep.subr.bf16.mxu1 %v3023_v32  ;;  %1018 = vmatprep.subr.bf16.mxu0 %v3025_v33 }
 0x149   :  { %978 = vmatpush1.bf16.msra.mxu1 %v3029_v34  ;;  %1019 = vmatpush1.bf16.msra.mxu0 %v3031_v35 }
 0x14a   :  { %1081 = vmatprep.subr.bf16.mxu1 %v2930_v38  ;;  %1122 = vmatprep.subr.bf16.mxu0 %v2932_v39 }
 0x1cc   :  { %v3085_v46 = vpop.f32.mrf.mxu1  ;;  %v3087_v47 = vpop.f32.mrf.mxu0 }
 0x1ce   :  { %v3091_v50 = vpop.f32.mrf.mxu1  ;;  %v3093_v51 = vpop.f32.mrf.mxu0 }
 0x1d0   :  { %v503_v58 = vpop.f32.mrf.mxu1  ;;  %v576_v59 = vpop.f32.mrf.mxu0 }
 0x1d1   :  { %v3103_v2 = vadd.f32 %v503_v58, %v288_v54  ;;  %v3106_v5 = vadd.f32 %v576_v59, %v3097_v55 }
 0x1d2   :  { %v505_v6 = vpop.f32.mrf.mxu1  ;;  %v578_v7 = vpop.f32.mrf.mxu0 }
 0x1d3   :  { %v3108_v12 = vadd.f32 %v505_v6, %v292_v62  ;;  %v3111_v13 = vadd.f32 %v578_v7, %v3101_v1 }
 0x1d4   :  { %v509_v18 = vpop.f32.mrf.mxu1  ;;  %v582_v19 = vpop.f32.mrf.mxu0 }
 0x1d5   :  { %v3113_v20 = vadd.f32 %v509_v18, %v288_v54  ;;  %v3116_v25 = vadd.f32 %v582_v19, %v3097_v55 }
 0x1d6   :  { %v511_v26 = vpop.f32.mrf.mxu1  ;;  %v584_v31 = vpop.f32.mrf.mxu0 }
 0x1d7   :  { %3516 = vst [vmem:[#allocation23_spill] sm:$0xff] %v3116_v25  ;;  %v3118_v36 = vadd.f32 %v511_v26, %v292_v62  ;;  %v3121_v37 = vadd.f32 %v584_v31, %v3101_v1 }
 0x1d8   :  { %v513_v41 = vpop.f32.mrf.mxu1  ;;  %v586_v44 = vpop.f32.mrf.mxu0 }
 0x1d9   :  { %v3123_v45 = vadd.f32 %v513_v41, %v288_v54  ;;  %v3126_v49 = vadd.f32 %v586_v44, %v3097_v55 }
 0x1da   :  { %v515_v58 = vpop.f32.mrf.mxu1  ;;  %v588_v59 = vpop.f32.mrf.mxu0 }
 0x1db   :  { %3517 = vst [vmem:[#allocation24_spill] sm:$0xff] %v3123_v45  ;;  %3518 = vst [vmem:[#allocation25_spill] sm:$0xff] %v3126_v49  ;;  %v3128_v6 = vadd.f32 %v515_v58, %v292_v62  ;;  %v3131_v7 = vadd.f32 %v588_v59, %v3101_v1 }
 0x1dc   :  { %v519_v18 = vpop.f32.mrf.mxu1  ;;  %v592_v19 = vpop.f32.mrf.mxu0 }
 0x1dd   :  { %3519 = vst [vmem:[#allocation26_spill] sm:$0xff] %v3128_v6  ;;  %3520 = vst [vmem:[#allocation27_spill] sm:$0xff] %v3131_v7  ;;  %v3133_v26 = vadd.f32 %v519_v18, %v288_v54  ;;  %v3136_v31 = vadd.f32 %v592_v19, %v3097_v55 }
 0x1de   :  { %v521_v48 = vpop.f32.mrf.mxu1  ;;  %v594_v41 = vpop.f32.mrf.mxu0 }
 0x1df   :  { %3521 = vst [vmem:[#allocation28_spill] sm:$0xff] %v3133_v26  ;;  %3522 = vst [vmem:[#allocation29_spill] sm:$0xff] %v3136_v31  ;;  %v3138_v43 = vadd.f32 %v521_v48, %v292_v62  ;;  %v3141_v44 = vadd.f32 %v594_v41, %v3101_v1 }
 0x1e0   :  { %v523_v40 = vpop.f32.mrf.mxu1  ;;  %v596_v58 = vpop.f32.mrf.mxu0 }
 0x1e1   :  { %3523 = vst [vmem:[#allocation30_spill] sm:$0xff] %v3138_v43  ;;  %3524 = vst [vmem:[#allocation31_spill] sm:$0xff] %v3141_v44  ;;  %v3143_v42 = vadd.f32 %v523_v40, %v288_v54  ;;  %v3146_v59 = vadd.f32 %v596_v58, %v3097_v55 }
 0x1e2   :  { %v525_v49 = vpop.f32.mrf.mxu1  ;;  %v598_v18 = vpop.f32.mrf.mxu0 }
 0x1e3   :  { %3525 = vst [vmem:[#allocation32_spill] sm:$0xff] %v3143_v42  ;;  %3526 = vst [vmem:[#allocation33_spill] sm:$0xff] %v3146_v59  ;;  %v3148_v26 = vadd.f32 %v525_v49, %v292_v62  ;;  %v3151_v19 = vadd.f32 %v598_v18, %v3101_v1 }
 0x1e4   :  { %v529_v31 = vpop.f32.mrf.mxu1  ;;  %v602_v48 = vpop.f32.mrf.mxu0 }
 0x1e5   :  { %3527 = vst [vmem:[#allocation34_spill] sm:$0xff] %v3148_v26  ;;  %3528 = vst [vmem:[#allocation35_spill] sm:$0xff] %v3151_v19  ;;  %v3153_v43 = vadd.f32 %v529_v31, %v288_v54  ;;  %v3156_v41 = vadd.f32 %v602_v48, %v3097_v55 }
 0x1e6   :  { %v531_v44 = vpop.f32.mrf.mxu1  ;;  %v604_v40 = vpop.f32.mrf.mxu0 }
 0x1e7   :  { %3529 = vst [vmem:[#allocation36_spill] sm:$0xff] %v3153_v43  ;;  %3530 = vst [vmem:[#allocation37_spill] sm:$0xff] %v3156_v41  ;;  %v3158_v42 = vadd.f32 %v531_v44, %v292_v62  ;;  %v3161_v58 = vadd.f32 %v604_v40, %v3101_v1  ;;  %v500_v43 = vadd.f32 %v3085_v46, %v288_v54 }
 0x1e8   :  { %v533_v59 = vpop.f32.mrf.mxu1  ;;  %v606_v49 = vpop.f32.mrf.mxu0  ;;  %v502_v40 = vadd.f32 %v3091_v50, %v292_v62 }
 0x1e9   :  { %3531 = vst [vmem:[#allocation38_spill] sm:$0xff] %v3158_v42  ;;  %3532 = vst [vmem:[#allocation39_spill] sm:$0xff] %v3161_v58  ;;  %v3163_v26 = vadd.f32 %v533_v59, %v288_v54  ;;  %v3166_v18 = vadd.f32 %v606_v49, %v3097_v55  ;;  %v575_v54 = vadd.f32 %v3093_v51, %v3101_v1  ;;  %v108_v51 = vld [vmem:[%s3496_s2] sm:$0xff] }
 0x1ea   :  { %v535_v19 = vpop.f32.mrf.mxu1  ;;  %v608_v31 = vpop.f32.mrf.mxu0 }
 0x1eb   :  { %3533 = vst [vmem:[#allocation40_spill] sm:$0xff] %v3163_v26  ;;  %3534 = vst [vmem:[#allocation41_spill] sm:$0xff] %v3166_v18  ;;  %v3169_v48 = vadd.f32 %v535_v19, %v292_v62  ;;  %v3172_v41 = vadd.f32 %v608_v31, %v3101_v1  ;;  %v573_v31 = vadd.f32 %v3087_v47, %v3097_v55 }
 0x1ec   :  { %v879_v44 = vpop.f32.mrf.mxu1  ;;  %v920_v42 = vpop.f32.mrf.mxu0 }
 0x1ed   :  { %v927_v58 = vadd.f32 %v879_v44, %v500_v43  ;;  %v929_v62 = vadd.f32 %v920_v42, %v573_v31 }
 0x1ee   :  { %v881_v7 = vpop.f32.mrf.mxu1  ;;  %v922_v59 = vpop.f32.mrf.mxu0 }
 0x1ef   :  { %v2244_v26 = vmul.f32 -1.442695, %v927_v58  ;;  %v928_v6 = vadd.f32 %v881_v7, %v502_v40  ;;  %v930_v19 = vadd.f32 %v922_v59, %v575_v54 }
 0x1f0   :  { %v883_v49 = vpop.f32.mrf.mxu1  ;;  %v924_v18 = vpop.f32.mrf.mxu0 }
 0x1f1   :  { %2497 = vpow2.f32 %v2244_v26  ;;  %v2245_v45 = vmul.f32 -1.442695, %v928_v6  ;;  %v2246_v50 = vmul.f32 -1.442695, %v930_v19 }
 0x1f2   :  { %v884_v25 = vpop.f32.mrf.mxu1  ;;  %v925_v46 = vpop.f32.mrf.mxu0 }
 0x1f3   :  { %2499 = vpow2.f32 %v2245_v45  ;;  %v3535_v46 = vmov 0  }
 0x1f4   :  { %2501 = vpow2.f32 %v2246_v50 }
 0x1fe   :  { %v2498_v43 = vpop.eup %2497 }
 0x1ff   :  { %v934_v44 = vadd.f32 1.0, %v2498_v43 }
 0x200   :  { %v2500_v58 = vpop.eup %2499 }
 0x201   :  { %2503 = vrcp.f32 %v934_v44  ;;  %v940_v7 = vadd.f32 1.0, %v2500_v58  ;;  %v2502_v25 = vpop.eup %2501 }
 0x202   :  { %2505 = vtanh.f32 %v929_v62  ;;  %v947_v26 = vadd.f32 1.0, %v2502_v25 }
 0x203   :  { %2507 = vrcp.f32 %v940_v7 }
 0x204   :  { %2509 = vrcp.f32 %v947_v26 }
 0x20e   :  { %v2504_v6 = vpop.eup %2503 }
 0x20f   :  { %v2506_v1 = vpop.eup %2505 }
 0x210   :  { %v2508_v45 = vpop.eup %2507  ;;  %v951_v47 = vmul.f32 %v2506_v1, %v2504_v6 }
 0x211   :  { %v950_v55 = vmul.f32 %v2508_v45, %v108_v51  ;;  %v2510_v42 = vpop.eup %2509 }
 0x213   :  { %v3182_v18 = vadd.f32 %v951_v47, %v950_v55 }
 0x215   :  { %2511 = vtanh.f32 %v3182_v18 }
 0x222   :  { %v2512_v40 = vpop.eup %2511 }
 0x223   :  { %v954_v59 = vmul.f32 %v2512_v40, %v2510_v42 }
 0x225   :  { %v962_v49 = vpack.c.bf16 %v954_v59, %v954_v59 }
 0x227   :  { %996 = vmatmul.mubr.bf16.vlgmr.msra.gmra.mxu1 %v962_v49  ;;  %1037 = vmatmul.mubr.bf16.vlgmr.msra.gmra.mxu0 %v962_v49 }
 0x228   :  { %1082 = vmatpush1.bf16.msra.mxu1 %v2941_v52  ;;  %1123 = vmatpush1.bf16.msra.mxu0 %v2943_v53 }
 0x229   :  { %1083 = vmatprep.subr.bf16.mxu1 %v2945_v56  ;;  %1124 = vmatprep.subr.bf16.mxu0 %v2947_v57 }
 0x22a   :  { %1113 = vmatprep.mubr.bf16.mxu1 %v3535_v46  ;;  %1154 = vmatprep.mubr.bf16.mxu0 %v3535_v46 }
 0x22c   :  { %1084 = vmatpush1.bf16.msra.mxu1 %v2951_v60  ;;  %1125 = vmatpush1.bf16.msra.mxu0 %v2953_v61 }
 0x22d   :  { %1085 = vmatprep.subr.bf16.mxu1 %v2957_v63  ;;  %1126 = vmatprep.subr.bf16.mxu0 %v2959_v0 }
 0x230   :  { %1086 = vmatpush1.bf16.msra.mxu1 %v2965_v3  ;;  %1127 = vmatpush1.bf16.msra.mxu0 %v2967_v4 }
 0x231   :  { %1087 = vmatprep.subr.bf16.mxu1 %v2971_v8  ;;  %1128 = vmatprep.subr.bf16.mxu0 %v2973_v9 }
 0x234   :  { %1088 = vmatpush1.bf16.msra.mxu1 %v2977_v10  ;;  %1129 = vmatpush1.bf16.msra.mxu0 %v2979_v11 }
 0x235   :  { %1089 = vmatprep.subr.bf16.mxu1 %v2983_v14  ;;  %1130 = vmatprep.subr.bf16.mxu0 %v2985_v15 }
 0x238   :  { %1090 = vmatpush1.bf16.msra.mxu1 %v2991_v16  ;;  %1131 = vmatpush1.bf16.msra.mxu0 %v2993_v17 }
 0x239   :  { %1091 = vmatprep.subr.bf16.mxu1 %v2997_v21  ;;  %1132 = vmatprep.subr.bf16.mxu0 %v2999_v22 }
 0x23c   :  { %1092 = vmatpush1.bf16.msra.mxu1 %v3003_v23  ;;  %1133 = vmatpush1.bf16.msra.mxu0 %v3005_v24 }
 0x23d   :  { %1093 = vmatprep.subr.bf16.mxu1 %v3009_v27  ;;  %1134 = vmatprep.subr.bf16.mxu0 %v3011_v28 }
 0x240   :  { %1094 = vmatpush1.bf16.msra.mxu1 %v3017_v29  ;;  %1135 = vmatpush1.bf16.msra.mxu0 %v3019_v30 }
 0x241   :  { %1095 = vmatprep.subr.bf16.mxu1 %v3023_v32  ;;  %1136 = vmatprep.subr.bf16.mxu0 %v3025_v33 }
 0x244   :  { %1096 = vmatpush1.bf16.msra.mxu1 %v3029_v34  ;;  %1137 = vmatpush1.bf16.msra.mxu0 %v3031_v35 }
 0x245   :  { %1199 = vmatprep.subr.bf16.mxu1 %v2930_v38  ;;  %1240 = vmatprep.subr.bf16.mxu0 %v2932_v39 }
 0x2e7   :  { %v997_v54 = vpop.f32.mrf.mxu1  ;;  %v1038_v19 = vpop.f32.mrf.mxu0 }
 0x2e8   :  { %v1045_v31 = vadd.f32 %v997_v54, %v3103_v2  ;;  %v1047_v45 = vadd.f32 %v1038_v19, %v3106_v5 }
 0x2e9   :  { %v999_v50 = vpop.f32.mrf.mxu1  ;;  %v1040_v43 = vpop.f32.mrf.mxu0 }
 0x2ea   :  { %v2247_v62 = vmul.f32 -1.442695, %v1045_v31  ;;  %v1046_v44 = vadd.f32 %v999_v50, %v3108_v12  ;;  %v1048_v1 = vadd.f32 %v1040_v43, %v3111_v13 }
 0x2eb   :  { %v1001_v58 = vpop.f32.mrf.mxu1  ;;  %v1042_v7 = vpop.f32.mrf.mxu0 }
 0x2ec   :  { %2513 = vpow2.f32 %v2247_v62  ;;  %v2248_v25 = vmul.f32 -1.442695, %v1046_v44  ;;  %v2249_v26 = vmul.f32 -1.442695, %v1048_v1 }
 0x2ed   :  { %v1002_v6 = vpop.f32.mrf.mxu1  ;;  %v1043_v51 = vpop.f32.mrf.mxu0 }
 0x2ee   :  { %2515 = vpow2.f32 %v2248_v25 }
 0x2ef   :  { %2517 = vtanh.f32 %v1047_v45 }
 0x2f0   :  { %2519 = vpow2.f32 %v2249_v26 }
 0x2f9   :  { %v2514_v47 = vpop.eup %2513 }
 0x2fa   :  { %v1052_v55 = vadd.f32 1.0, %v2514_v47 }
 0x2fb   :  { %v2516_v2 = vpop.eup %2515 }
 0x2fc   :  { %2521 = vrcp.f32 %v1052_v55  ;;  %v1058_v42 = vadd.f32 1.0, %v2516_v2  ;;  %v2518_v12 = vpop.eup %2517 }
 0x2fd   :  { %v2520_v40 = vpop.eup %2519 }
 0x2fe   :  { %2523 = vrcp.f32 %v1058_v42  ;;  %v1065_v31 = vadd.f32 1.0, %v2520_v40  ;;  %v3536_v42 = vld [vmem:[#allocation23_spill] sm:$0xff] }
 0x300   :  { %2525 = vrcp.f32 %v1065_v31 }
 0x309   :  { %v2522_v59 = vpop.eup %2521 }
 0x30a   :  { %v1069_v49 = vmul.f32 %v2522_v59, %v2518_v12 }
 0x30b   :  { %v2524_v54 = vpop.eup %2523 }
 0x30c   :  { %v1068_v50 = vmul.f32 %v2524_v54, %v3182_v18 }
 0x30d   :  { %v2526_v5 = vpop.eup %2525 }
 0x30e   :  { %v3224_v13 = vadd.f32 %v1069_v49, %v1068_v50 }
 0x310   :  { %2527 = vtanh.f32 %v3224_v13 }
 0x31d   :  { %v2528_v19 = vpop.eup %2527 }
 0x31e   :  { %v1072_v43 = vmul.f32 %v2528_v19, %v2526_v5 }
 0x320   :  { %v1080_v62 = vpack.c.bf16 %v1072_v43, %v1072_v43 }
 0x322   :  { %1114 = vmatmul.mubr.bf16.vlgmr.msra.gmra.mxu1 %v1080_v62  ;;  %1155 = vmatmul.mubr.bf16.vlgmr.msra.gmra.mxu0 %v1080_v62 }
 0x323   :  { %1200 = vmatpush1.bf16.msra.mxu1 %v2941_v52  ;;  %1241 = vmatpush1.bf16.msra.mxu0 %v2943_v53 }
 0x324   :  { %1201 = vmatprep.subr.bf16.mxu1 %v2945_v56  ;;  %1242 = vmatprep.subr.bf16.mxu0 %v2947_v57 }
 0x325   :  { %1231 = vmatprep.mubr.bf16.mxu1 %v3535_v46  ;;  %1272 = vmatprep.mubr.bf16.mxu0 %v3535_v46 }
 0x327   :  { %1202 = vmatpush1.bf16.msra.mxu1 %v2951_v60  ;;  %1243 = vmatpush1.bf16.msra.mxu0 %v2953_v61 }
 0x328   :  { %1203 = vmatprep.subr.bf16.mxu1 %v2957_v63  ;;  %1244 = vmatprep.subr.bf16.mxu0 %v2959_v0 }
 0x32b   :  { %1204 = vmatpush1.bf16.msra.mxu1 %v2965_v3  ;;  %1245 = vmatpush1.bf16.msra.mxu0 %v2967_v4 }
 0x32c   :  { %1205 = vmatprep.subr.bf16.mxu1 %v2971_v8  ;;  %1246 = vmatprep.subr.bf16.mxu0 %v2973_v9 }
 0x32f   :  { %1206 = vmatpush1.bf16.msra.mxu1 %v2977_v10  ;;  %1247 = vmatpush1.bf16.msra.mxu0 %v2979_v11 }
 0x330   :  { %1207 = vmatprep.subr.bf16.mxu1 %v2983_v14  ;;  %1248 = vmatprep.subr.bf16.mxu0 %v2985_v15 }
 0x333   :  { %1208 = vmatpush1.bf16.msra.mxu1 %v2991_v16  ;;  %1249 = vmatpush1.bf16.msra.mxu0 %v2993_v17 }
 0x334   :  { %1209 = vmatprep.subr.bf16.mxu1 %v2997_v21  ;;  %1250 = vmatprep.subr.bf16.mxu0 %v2999_v22 }
 0x337   :  { %1210 = vmatpush1.bf16.msra.mxu1 %v3003_v23  ;;  %1251 = vmatpush1.bf16.msra.mxu0 %v3005_v24 }
 0x338   :  { %1211 = vmatprep.subr.bf16.mxu1 %v3009_v27  ;;  %1252 = vmatprep.subr.bf16.mxu0 %v3011_v28 }
 0x33b   :  { %1212 = vmatpush1.bf16.msra.mxu1 %v3017_v29  ;;  %1253 = vmatpush1.bf16.msra.mxu0 %v3019_v30 }
 0x33c   :  { %1213 = vmatprep.subr.bf16.mxu1 %v3023_v32  ;;  %1254 = vmatprep.subr.bf16.mxu0 %v3025_v33 }
 0x33f   :  { %1214 = vmatpush1.bf16.msra.mxu1 %v3029_v34  ;;  %1255 = vmatpush1.bf16.msra.mxu0 %v3031_v35 }
 0x340   :  { %1317 = vmatprep.subr.bf16.mxu1 %v2930_v38  ;;  %1358 = vmatprep.subr.bf16.mxu0 %v2932_v39 }
 0x3e2   :  { %v1115_v18 = vpop.f32.mrf.mxu1  ;;  %v1156_v44 = vpop.f32.mrf.mxu0 }
 0x3e3   :  { %v1163_v58 = vadd.f32 %v1115_v18, %v3113_v20  ;;  %v1165_v12 = vadd.f32 %v1156_v44, %v3536_v42 }
 0x3e4   :  { %v1117_v7 = vpop.f32.mrf.mxu1  ;;  %v1158_v25 = vpop.f32.mrf.mxu0 }
 0x3e5   :  { %v2250_v6 = vmul.f32 -1.442695, %v1163_v58  ;;  %v1164_v51 = vadd.f32 %v1117_v7, %v3118_v36  ;;  %v1166_v2 = vadd.f32 %v1158_v25, %v3121_v37 }
 0x3e6   :  { %v1119_v1 = vpop.f32.mrf.mxu1  ;;  %v1160_v45 = vpop.f32.mrf.mxu0 }
 0x3e7   :  { %2529 = vpow2.f32 %v2250_v6  ;;  %v2251_v26 = vmul.f32 -1.442695, %v1164_v51  ;;  %v2252_v40 = vmul.f32 -1.442695, %v1166_v2  ;;  %v3537_v6 = vld [vmem:[#allocation24_spill] sm:$0xff] }
 0x3e8   :  { %v1120_v47 = vpop.f32.mrf.mxu1  ;;  %v1161_v55 = vpop.f32.mrf.mxu0 }
 0x3e9   :  { %2531 = vpow2.f32 %v2251_v26  ;;  %v3538_v47 = vld [vmem:[#allocation26_spill] sm:$0xff] }
 0x3ea   :  { %2533 = vtanh.f32 %v1165_v12 }
 0x3eb   :  { %2535 = vpow2.f32 %v2252_v40 }
 0x3f4   :  { %v2530_v59 = vpop.eup %2529 }
 0x3f5   :  { %v1170_v49 = vadd.f32 1.0, %v2530_v59 }
 0x3f6   :  { %v2532_v20 = vpop.eup %2531 }
 0x3f7   :  { %2537 = vrcp.f32 %v1170_v49  ;;  %v1176_v54 = vadd.f32 1.0, %v2532_v20  ;;  %v2534_v36 = vpop.eup %2533  ;;  %v3539_v49 = vld [vmem:[#allocation27_spill] sm:$0xff]  ;;  %v3540_v20 = vld [vmem:[#allocation25_spill] sm:$0xff] }
 0x3f8   :  { %v2536_v31 = vpop.eup %2535 }
 0x3f9   :  { %2539 = vrcp.f32 %v1176_v54  ;;  %v1183_v43 = vadd.f32 1.0, %v2536_v31 }
 0x3fb   :  { %2541 = vrcp.f32 %v1183_v43 }
 0x404   :  { %v2538_v50 = vpop.eup %2537 }
 0x405   :  { %v1187_v5 = vmul.f32 %v2538_v50, %v2534_v36 }
 0x406   :  { %v2540_v19 = vpop.eup %2539 }
 0x407   :  { %v1186_v62 = vmul.f32 %v2540_v19, %v3224_v13 }
 0x408   :  { %v2542_v18 = vpop.eup %2541 }
 0x409   :  { %v3266_v37 = vadd.f32 %v1187_v5, %v1186_v62 }
 0x40b   :  { %2543 = vtanh.f32 %v3266_v37 }
 0x418   :  { %v2544_v44 = vpop.eup %2543 }
 0x419   :  { %v1190_v58 = vmul.f32 %v2544_v44, %v2542_v18 }
 0x41b   :  { %v1198_v7 = vpack.c.bf16 %v1190_v58, %v1190_v58 }
 0x41d   :  { %1232 = vmatmul.mubr.bf16.vlgmr.msra.gmra.mxu1 %v1198_v7  ;;  %1273 = vmatmul.mubr.bf16.vlgmr.msra.gmra.mxu0 %v1198_v7 }
 0x41e   :  { %1318 = vmatpush1.bf16.msra.mxu1 %v2941_v52  ;;  %1359 = vmatpush1.bf16.msra.mxu0 %v2943_v53 }
 0x41f   :  { %1319 = vmatprep.subr.bf16.mxu1 %v2945_v56  ;;  %1360 = vmatprep.subr.bf16.mxu0 %v2947_v57 }
 0x420   :  { %1349 = vmatprep.mubr.bf16.mxu1 %v3535_v46  ;;  %1390 = vmatprep.mubr.bf16.mxu0 %v3535_v46 }
 0x422   :  { %1320 = vmatpush1.bf16.msra.mxu1 %v2951_v60  ;;  %1361 = vmatpush1.bf16.msra.mxu0 %v2953_v61 }
 0x423   :  { %1321 = vmatprep.subr.bf16.mxu1 %v2957_v63  ;;  %1362 = vmatprep.subr.bf16.mxu0 %v2959_v0 }
 0x426   :  { %1322 = vmatpush1.bf16.msra.mxu1 %v2965_v3  ;;  %1363 = vmatpush1.bf16.msra.mxu0 %v2967_v4 }
 0x427   :  { %1323 = vmatprep.subr.bf16.mxu1 %v2971_v8  ;;  %1364 = vmatprep.subr.bf16.mxu0 %v2973_v9 }
 0x42a   :  { %1324 = vmatpush1.bf16.msra.mxu1 %v2977_v10  ;;  %1365 = vmatpush1.bf16.msra.mxu0 %v2979_v11 }
 0x42b   :  { %1325 = vmatprep.subr.bf16.mxu1 %v2983_v14  ;;  %1366 = vmatprep.subr.bf16.mxu0 %v2985_v15 }
 0x42e   :  { %1326 = vmatpush1.bf16.msra.mxu1 %v2991_v16  ;;  %1367 = vmatpush1.bf16.msra.mxu0 %v2993_v17 }
 0x42f   :  { %1327 = vmatprep.subr.bf16.mxu1 %v2997_v21  ;;  %1368 = vmatprep.subr.bf16.mxu0 %v2999_v22 }
 0x432   :  { %1328 = vmatpush1.bf16.msra.mxu1 %v3003_v23  ;;  %1369 = vmatpush1.bf16.msra.mxu0 %v3005_v24 }
 0x433   :  { %1329 = vmatprep.subr.bf16.mxu1 %v3009_v27  ;;  %1370 = vmatprep.subr.bf16.mxu0 %v3011_v28 }
 0x436   :  { %1330 = vmatpush1.bf16.msra.mxu1 %v3017_v29  ;;  %1371 = vmatpush1.bf16.msra.mxu0 %v3019_v30 }
 0x437   :  { %1331 = vmatprep.subr.bf16.mxu1 %v3023_v32  ;;  %1372 = vmatprep.subr.bf16.mxu0 %v3025_v33 }
 0x43a   :  { %1332 = vmatpush1.bf16.msra.mxu1 %v3029_v34  ;;  %1373 = vmatpush1.bf16.msra.mxu0 %v3031_v35 }
 0x43b   :  { %1435 = vmatprep.subr.bf16.mxu1 %v2930_v38  ;;  %1476 = vmatprep.subr.bf16.mxu0 %v2932_v39 }
 0x4dd   :  { %v1233_v13 = vpop.f32.mrf.mxu1  ;;  %v1274_v25 = vpop.f32.mrf.mxu0 }
 0x4de   :  { %v1281_v51 = vadd.f32 %v1233_v13, %v3537_v6  ;;  %v1283_v39 = vadd.f32 %v1274_v25, %v3540_v20 }
 0x4df   :  { %v1235_v1 = vpop.f32.mrf.mxu1  ;;  %v1276_v45 = vpop.f32.mrf.mxu0 }
 0x4e0   :  { %v2253_v26 = vmul.f32 -1.442695, %v1281_v51  ;;  %v1282_v55 = vadd.f32 %v1235_v1, %v3538_v47  ;;  %v1284_v38 = vadd.f32 %v1276_v45, %v3539_v49 }
 0x4e1   :  { %v1237_v2 = vpop.f32.mrf.mxu1  ;;  %v1278_v42 = vpop.f32.mrf.mxu0 }
 0x4e2   :  { %2545 = vpow2.f32 %v2253_v26  ;;  %v2254_v12 = vmul.f32 -1.442695, %v1282_v55  ;;  %v2255_v54 = vmul.f32 -1.442695, %v1284_v38 }
 0x4e3   :  { %v1238_v40 = vpop.f32.mrf.mxu1  ;;  %v1279_v59 = vpop.f32.mrf.mxu0 }
 0x4e4   :  { %2547 = vpow2.f32 %v2254_v12 }
 0x4e5   :  { %2549 = vtanh.f32 %v1283_v39 }
 0x4e6   :  { %2551 = vpow2.f32 %v2255_v54 }
 0x4ef   :  { %v2546_v36 = vpop.eup %2545 }
 0x4f0   :  { %v1288_v31 = vadd.f32 1.0, %v2546_v36 }
 0x4f1   :  { %v2548_v50 = vpop.eup %2547 }
 0x4f2   :  { %2553 = vrcp.f32 %v1288_v31  ;;  %v1294_v5 = vadd.f32 1.0, %v2548_v50  ;;  %v2550_v19 = vpop.eup %2549  ;;  %v3357_v50 = vld [vmem:[#allocation8 + $0xe0] ss:$16 sps:$4 sm:$0xff]  }
 0x4f3   :  { %v2552_v43 = vpop.eup %2551 }
 0x4f4   :  { %2555 = vrcp.f32 %v1294_v5  ;;  %v1301_v58 = vadd.f32 1.0, %v2552_v43  ;;  %v3360_v5 = vld [vmem:[#allocation8 + $0xe8] ss:$16 sps:$4 sm:$0xff]   ;;  %v3366_v43 = vld [vmem:[#allocation8 + $0xcc] ss:$16 sps:$4 sm:$0xff]  }
 0x4f6   :  { %2557 = vrcp.f32 %v1301_v58  ;;  %v3380_v58 = vld [vmem:[#allocation8 + $0xac] ss:$16 sps:$4 sm:$0xff]  }
 0x4ff   :  { %v2554_v62 = vpop.eup %2553 }
 0x500   :  { %v1305_v18 = vmul.f32 %v2554_v62, %v2550_v19  ;;  %v3363_v19 = vld [vmem:[#allocation8 + $0xc4] ss:$16 sps:$4 sm:$0xff]   ;;  %v3371_v62 = vld [vmem:[#allocation8 + $0xc0] ss:$16 sps:$4 sm:$0xff]  }
 0x501   :  { %v2556_v44 = vpop.eup %2555 }
 0x502   :  { %v1304_v7 = vmul.f32 %v2556_v44, %v3266_v37  ;;  %v3377_v44 = vld [vmem:[#allocation8 + $0xa4] ss:$16 sps:$4 sm:$0xff]  }
 0x503   :  { %v2558_v25 = vpop.eup %2557 }
 0x504   :  { %v3308_v13 = vadd.f32 %v1305_v18, %v1304_v7  ;;  %v3374_v18 = vld [vmem:[#allocation8 + $0xc8] ss:$16 sps:$4 sm:$0xff]   ;;  %v3383_v7 = vld [vmem:[#allocation8 + $0xa0] ss:$16 sps:$4 sm:$0xff]  }
 0x506   :  { %2559 = vtanh.f32 %v3308_v13 }
 0x513   :  { %v2560_v6 = vpop.eup %2559 }
 0x514   :  { %v1308_v51 = vmul.f32 %v2560_v6, %v2558_v25  ;;  %v3389_v25 = vld [vmem:[#allocation8 + $0x84] ss:$16 sps:$4 sm:$0xff]   ;;  %v3392_v6 = vld [vmem:[#allocation8 + $0x8c] ss:$16 sps:$4 sm:$0xff]  }
 0x516   :  { %v1316_v1 = vpack.c.bf16 %v1308_v51, %v1308_v51  ;;  %v3395_v51 = vld [vmem:[#allocation8 + $0x80] ss:$16 sps:$4 sm:$0xff]  }
 0x518   :  { %1350 = vmatmul.mubr.bf16.vlgmr.msra.gmra.mxu1 %v1316_v1  ;;  %1391 = vmatmul.mubr.bf16.vlgmr.msra.gmra.mxu0 %v1316_v1  ;;  %v3398_v1 = vld [vmem:[#allocation8 + $0x88] ss:$16 sps:$4 sm:$0xff]  }
 0x519   :  { %1436 = vmatpush1.bf16.msra.mxu1 %v2941_v52  ;;  %1477 = vmatpush1.bf16.msra.mxu0 %v2943_v53  ;;  %v3343_v52 = vld [vmem:[#allocation8 + $0xe4] ss:$16 sps:$4 sm:$0xff]   ;;  %v3346_v53 = vld [vmem:[#allocation8 + $0xec] ss:$16 sps:$4 sm:$0xff]  }
 0x51a   :  { %1437 = vmatprep.subr.bf16.mxu1 %v2945_v56  ;;  %1478 = vmatprep.subr.bf16.mxu0 %v2947_v57 }
 0x51b   :  { %1467 = vmatprep.mubr.bf16.mxu1 %v3535_v46  ;;  %1508 = vmatprep.mubr.bf16.mxu0 %v3535_v46 }
 0x51d   :  { %1438 = vmatpush1.bf16.msra.mxu1 %v2951_v60  ;;  %1479 = vmatpush1.bf16.msra.mxu0 %v2953_v61  ;;  %v3541_v60 = vld [vmem:[#allocation28_spill] sm:$0xff] }
 0x51e   :  { %1439 = vmatprep.subr.bf16.mxu1 %v2957_v63  ;;  %1480 = vmatprep.subr.bf16.mxu0 %v2959_v0 }
 0x521   :  { %1440 = vmatpush1.bf16.msra.mxu1 %v2965_v3  ;;  %1481 = vmatpush1.bf16.msra.mxu0 %v2967_v4  ;;  %v3542_v4 = vld [vmem:[#allocation30_spill] sm:$0xff] }
 0x522   :  { %1441 = vmatprep.subr.bf16.mxu1 %v2971_v8  ;;  %1482 = vmatprep.subr.bf16.mxu0 %v2973_v9 }
 0x525   :  { %1442 = vmatpush1.bf16.msra.mxu1 %v2977_v10  ;;  %1483 = vmatpush1.bf16.msra.mxu0 %v2979_v11 }
 0x526   :  { %1443 = vmatprep.subr.bf16.mxu1 %v2983_v14  ;;  %1484 = vmatprep.subr.bf16.mxu0 %v2985_v15 }
 0x529   :  { %1444 = vmatpush1.bf16.msra.mxu1 %v2991_v16  ;;  %1485 = vmatpush1.bf16.msra.mxu0 %v2993_v17  ;;  %v3543_v16 = vld [vmem:[#allocation31_spill] sm:$0xff] }
 0x52a   :  { %1445 = vmatprep.subr.bf16.mxu1 %v2997_v21  ;;  %1486 = vmatprep.subr.bf16.mxu0 %v2999_v22  ;;  %v3544_v21 = vld [vmem:[#allocation29_spill] sm:$0xff] }
 0x52d   :  { %1446 = vmatpush1.bf16.msra.mxu1 %v3003_v23  ;;  %1487 = vmatpush1.bf16.msra.mxu0 %v3005_v24 }
 0x52e   :  { %1447 = vmatprep.subr.bf16.mxu1 %v3009_v27  ;;  %1488 = vmatprep.subr.bf16.mxu0 %v3011_v28 }
 0x531   :  { %1448 = vmatpush1.bf16.msra.mxu1 %v3017_v29  ;;  %1489 = vmatpush1.bf16.msra.mxu0 %v3019_v30 }
 0x532   :  { %1449 = vmatprep.subr.bf16.mxu1 %v3023_v32  ;;  %1490 = vmatprep.subr.bf16.mxu0 %v3025_v33 }
 0x535   :  { %1450 = vmatpush1.bf16.msra.mxu1 %v3029_v34  ;;  %1491 = vmatpush1.bf16.msra.mxu0 %v3031_v35 }
 0x536   :  { %1553 = vmatprep.subr.bf16.mxu1 %v3343_v52  ;;  %1594 = vmatprep.subr.bf16.mxu0 %v3346_v53 }
 0x5d8   :  { %v1351_v56 = vpop.f32.mrf.mxu1  ;;  %v1392_v57 = vpop.f32.mrf.mxu0 }
 0x5d9   :  { %v1399_v61 = vadd.f32 %v1351_v56, %v3541_v60  ;;  %v1401_v22 = vadd.f32 %v1392_v57, %v3544_v21  ;;  %v3401_v56 = vld [vmem:[#allocation8 + $0x64] ss:$16 sps:$4 sm:$0xff]   ;;  %v3404_v57 = vld [vmem:[#allocation8 + $0x6c] ss:$16 sps:$4 sm:$0xff]   ;;  %v3407_v60 = vld [vmem:[#allocation8 + $0x60] ss:$16 sps:$4 sm:$0xff]  }
 0x5da   :  { %v1353_v63 = vpop.f32.mrf.mxu1  ;;  %v1394_v0 = vpop.f32.mrf.mxu0 }
 0x5db   :  { %v2256_v3 = vmul.f32 -1.442695, %v1399_v61  ;;  %v1400_v8 = vadd.f32 %v1353_v63, %v3542_v4  ;;  %v1402_v17 = vadd.f32 %v1394_v0, %v3543_v16  ;;  %v3410_v61 = vld [vmem:[#allocation8 + $0x68] ss:$16 sps:$4 sm:$0xff]   ;;  %v3413_v63 = vld [vmem:[#allocation8 + $0x44] ss:$16 sps:$4 sm:$0xff]  }
 0x5dc   :  { %v1355_v9 = vpop.f32.mrf.mxu1  ;;  %v1396_v10 = vpop.f32.mrf.mxu0  ;;  %v3416_v0 = vld [vmem:[#allocation8 + $0x4c] ss:$16 sps:$4 sm:$0xff]  }
 0x5dd   :  { %2561 = vpow2.f32 %v2256_v3  ;;  %v2257_v11 = vmul.f32 -1.442695, %v1400_v8  ;;  %v2258_v37 = vmul.f32 -1.442695, %v1402_v17 }
 0x5de   :  { %v1356_v14 = vpop.f32.mrf.mxu1  ;;  %v1397_v15 = vpop.f32.mrf.mxu0 }
 0x5df   :  { %2563 = vpow2.f32 %v2257_v11  ;;  %v3548_v11 = vld [vmem:[#allocation33_spill] sm:$0xff] }
 0x5e0   :  { %2565 = vtanh.f32 %v1401_v22 }
 0x5e1   :  { %2567 = vpow2.f32 %v2258_v37 }
 0x5ea   :  { %v2562_v45 = vpop.eup %2561 }
 0x5eb   :  { %v1406_v26 = vadd.f32 1.0, %v2562_v45 }
 0x5ec   :  { %v2564_v47 = vpop.eup %2563 }
 0x5ed   :  { %2569 = vrcp.f32 %v1406_v26  ;;  %v1412_v55 = vadd.f32 1.0, %v2564_v47  ;;  %v2566_v2 = vpop.eup %2565 }
 0x5ee   :  { %v2568_v42 = vpop.eup %2567 }
 0x5ef   :  { %2571 = vrcp.f32 %v1412_v55  ;;  %v1419_v49 = vadd.f32 1.0, %v2568_v42 }
 0x5f1   :  { %2573 = vrcp.f32 %v1419_v49 }
 0x5fa   :  { %v2570_v12 = vpop.eup %2569 }
 0x5fb   :  { %v1423_v40 = vmul.f32 %v2570_v12, %v2566_v2 }
 0x5fc   :  { %v2572_v59 = vpop.eup %2571 }
 0x5fd   :  { %v1422_v38 = vmul.f32 %v2572_v59, %v3308_v13  ;;  %v3386_v13 = vld [vmem:[#allocation8 + $0xa8] ss:$16 sps:$4 sm:$0xff]  }
 0x5fe   :  { %v2574_v39 = vpop.eup %2573 }
 0x5ff   :  { %v3354_v20 = vadd.f32 %v1423_v40, %v1422_v38  ;;  %v2647_v38 = vld [vmem:[#allocation8 + $0x40] ss:$16 sps:$4 sm:$0xff]  }
 0x601   :  { %2575 = vtanh.f32 %v3354_v20 }
 0x60e   :  { %v2576_v54 = vpop.eup %2575 }
 0x60f   :  { %v1426_v36 = vmul.f32 %v2576_v54, %v2574_v39  ;;  %v2649_v39 = vld [vmem:[#allocation8 + $0x24] ss:$16 sps:$4 sm:$0xff]   ;;  %v2650_v54 = vld [vmem:[#allocation8 + $0x2c] ss:$16 sps:$4 sm:$0xff]  }
 0x611   :  { %v1434_v31 = vpack.c.bf16 %v1426_v36, %v1426_v36  ;;  %v2651_v36 = vld [vmem:[#allocation8 + $0x20] ss:$16 sps:$4 sm:$0xff]  }
 0x613   :  { %1468 = vmatmul.mubr.bf16.vlgmr.msra.gmra.mxu1 %v1434_v31  ;;  %1509 = vmatmul.mubr.bf16.vlgmr.msra.gmra.mxu0 %v1434_v31  ;;  %v2652_v31 = vld [vmem:[#allocation8 + $0x28] ss:$16 sps:$4 sm:$0xff]  }
 0x614   :  { %1554 = vmatpush1.bf16.msra.mxu1 %v3357_v50  ;;  %1595 = vmatpush1.bf16.msra.mxu0 %v3360_v5 }
 0x615   :  { %1555 = vmatprep.subr.bf16.mxu1 %v3363_v19  ;;  %1596 = vmatprep.subr.bf16.mxu0 %v3366_v43 }
 0x616   :  { %1585 = vmatprep.mubr.bf16.mxu1 %v3535_v46  ;;  %1626 = vmatprep.mubr.bf16.mxu0 %v3535_v46 }
 0x618   :  { %1556 = vmatpush1.bf16.msra.mxu1 %v3371_v62  ;;  %1597 = vmatpush1.bf16.msra.mxu0 %v3374_v18 }
 0x619   :  { %1557 = vmatprep.subr.bf16.mxu1 %v3377_v44  ;;  %1598 = vmatprep.subr.bf16.mxu0 %v3380_v58 }
 0x61c   :  { %1558 = vmatpush1.bf16.msra.mxu1 %v3383_v7  ;;  %1599 = vmatpush1.bf16.msra.mxu0 %v3386_v13 }
 0x61d   :  { %1559 = vmatprep.subr.bf16.mxu1 %v3389_v25  ;;  %1600 = vmatprep.subr.bf16.mxu0 %v3392_v6 }
 0x620   :  { %1560 = vmatpush1.bf16.msra.mxu1 %v3395_v51  ;;  %1601 = vmatpush1.bf16.msra.mxu0 %v3398_v1 }
 0x621   :  { %1561 = vmatprep.subr.bf16.mxu1 %v3401_v56  ;;  %1602 = vmatprep.subr.bf16.mxu0 %v3404_v57 }
 0x624   :  { %1562 = vmatpush1.bf16.msra.mxu1 %v3407_v60  ;;  %1603 = vmatpush1.bf16.msra.mxu0 %v3410_v61 }
 0x625   :  { %1563 = vmatprep.subr.bf16.mxu1 %v3413_v63  ;;  %1604 = vmatprep.subr.bf16.mxu0 %v3416_v0 }
 0x628   :  { %1564 = vmatpush1.bf16.msra.mxu1 %v3003_v23  ;;  %1605 = vmatpush1.bf16.msra.mxu0 %v3005_v24 }
 0x629   :  { %1565 = vmatprep.subr.bf16.mxu1 %v3009_v27  ;;  %1606 = vmatprep.subr.bf16.mxu0 %v3011_v28  ;;  %v3545_v27 = vld [vmem:[#allocation32_spill] sm:$0xff] }
 0x62c   :  { %1566 = vmatpush1.bf16.msra.mxu1 %v3017_v29  ;;  %1607 = vmatpush1.bf16.msra.mxu0 %v3019_v30  ;;  %v3546_v30 = vld [vmem:[#allocation34_spill] sm:$0xff] }
 0x62d   :  { %1567 = vmatprep.subr.bf16.mxu1 %v3023_v32  ;;  %1608 = vmatprep.subr.bf16.mxu0 %v3025_v33 }
 0x630   :  { %1568 = vmatpush1.bf16.msra.mxu1 %v3029_v34  ;;  %1609 = vmatpush1.bf16.msra.mxu0 %v3031_v35  ;;  %v3547_v35 = vld [vmem:[#allocation35_spill] sm:$0xff] }
 0x631   :  { %1671 = vmatprep.subr.bf16.mxu1 %v3343_v52  ;;  %1712 = vmatprep.subr.bf16.mxu0 %v3346_v53 }
 0x6d3   :  { %v1469_v23 = vpop.f32.mrf.mxu1  ;;  %v1510_v24 = vpop.f32.mrf.mxu0 }
 0x6d4   :  { %v1517_v28 = vadd.f32 %v1469_v23, %v3545_v27  ;;  %v1519_v53 = vadd.f32 %v1510_v24, %v3548_v11  ;;  %v3552_v23 = vld [vmem:[#allocation37_spill] sm:$0xff] }
 0x6d5   :  { %v1471_v3 = vpop.f32.mrf.mxu1  ;;  %v1512_v29 = vpop.f32.mrf.mxu0 }
 0x6d6   :  { %v2259_v4 = vmul.f32 -1.442695, %v1517_v28  ;;  %v1518_v8 = vadd.f32 %v1471_v3, %v3546_v30  ;;  %v1520_v52 = vadd.f32 %v1512_v29, %v3547_v35 }
 0x6d7   :  { %v1473_v32 = vpop.f32.mrf.mxu1  ;;  %v1514_v9 = vpop.f32.mrf.mxu0 }
 0x6d8   :  { %2577 = vpow2.f32 %v2259_v4  ;;  %v2260_v33 = vmul.f32 -1.442695, %v1518_v8  ;;  %v2261_v14 = vmul.f32 -1.442695, %v1520_v52 }
 0x6d9   :  { %v1474_v34 = vpop.f32.mrf.mxu1  ;;  %v1515_v10 = vpop.f32.mrf.mxu0 }
 0x6da   :  { %2579 = vpow2.f32 %v2260_v33 }
 0x6db   :  { %2581 = vtanh.f32 %v1519_v53 }
 0x6dc   :  { %2583 = vpow2.f32 %v2261_v14 }
 0x6e5   :  { %v2578_v15 = vpop.eup %2577 }
 0x6e6   :  { %v1524_v16 = vadd.f32 1.0, %v2578_v15  ;;  %v2459_v15 = vld [vmem:[#allocation10 + $0x74] ss:$8 sps:$4 sm:$0xff]  }
 0x6e7   :  { %v2580_v17 = vpop.eup %2579 }
 0x6e8   :  { %2585 = vrcp.f32 %v1524_v16  ;;  %v1530_v21 = vadd.f32 1.0, %v2580_v17  ;;  %v2582_v22 = vpop.eup %2581  ;;  %v2457_v16 = vld [vmem:[#allocation10 + $0x70] ss:$8 sps:$4 sm:$0xff]   ;;  %v2462_v17 = vld [vmem:[#allocation10 + $0x64] ss:$8 sps:$4 sm:$0xff]  }
 0x6e9   :  { %v2584_v37 = vpop.eup %2583 }
 0x6ea   :  { %2587 = vrcp.f32 %v1530_v21  ;;  %v1537_v55 = vadd.f32 1.0, %v2584_v37  ;;  %v2460_v21 = vld [vmem:[#allocation10 + $0x60] ss:$8 sps:$4 sm:$0xff]   ;;  %v2463_v37 = vld [vmem:[#allocation10 + $0x50] ss:$8 sps:$4 sm:$0xff]  }
 0x6ec   :  { %2589 = vrcp.f32 %v1537_v55  ;;  %v2471_v55 = vld [vmem:[#allocation10 + $0x34] ss:$8 sps:$4 sm:$0xff]  }
 0x6f5   :  { %v2586_v45 = vpop.eup %2585 }
 0x6f6   :  { %v1541_v26 = vmul.f32 %v2586_v45, %v2582_v22  ;;  %v2465_v22 = vld [vmem:[#allocation10 + $0x54] ss:$8 sps:$4 sm:$0xff]   ;;  %v2468_v45 = vld [vmem:[#allocation10 + $0x44] ss:$8 sps:$4 sm:$0xff]  }
 0x6f7   :  { %v2588_v47 = vpop.eup %2587 }
 0x6f8   :  { %v1540_v2 = vmul.f32 %v2588_v47, %v3354_v20  ;;  %v2648_v20 = vld [vmem:[#allocation8 + $0x48] ss:$16 sps:$4 sm:$0xff]  }
 0x6f9   :  { %v2590_v12 = vpop.eup %2589  ;;  %v2469_v47 = vld [vmem:[#allocation10 + $0x30] ss:$8 sps:$4 sm:$0xff]  }
 0x6fa   :  { %v3436_v42 = vadd.f32 %v1541_v26, %v1540_v2  ;;  %v2466_v26 = vld [vmem:[#allocation10 + $0x40] ss:$8 sps:$4 sm:$0xff]   ;;  %v2474_v2 = vld [vmem:[#allocation10 + $0x24] ss:$8 sps:$4 sm:$0xff]  }
 0x6fc   :  { %2591 = vtanh.f32 %v3436_v42 }
 0x709   :  { %v2592_v40 = vpop.eup %2591 }
 0x70a   :  { %v1544_v59 = vmul.f32 %v2592_v40, %v2590_v12  ;;  %v2475_v12 = vld [vmem:[#allocation10 + $0x10] ss:$8 sps:$4 sm:$0xff]   ;;  %v2480_v40 = vld [vmem:[#allocation10 + $0x4] ss:$8 sps:$4 sm:$0xff]  }
 0x70c   :  { %v1552_v49 = vpack.c.bf16 %v1544_v59, %v1544_v59  ;;  %v2478_v59 = vld [vmem:[#allocation10] ss:$8 sps:$4 sm:$0xff]  }
 0x70e   :  { %1586 = vmatmul.mubr.bf16.vlgmr.msra.gmra.mxu1 %v1552_v49  ;;  %1627 = vmatmul.mubr.bf16.vlgmr.msra.gmra.mxu0 %v1552_v49  ;;  %v2481_v49 = vld [vmem:[#allocation11 + $0x78] sm:$0xff]  }
 0x70f   :  { %1672 = vmatpush1.bf16.msra.mxu1 %v3357_v50  ;;  %1713 = vmatpush1.bf16.msra.mxu0 %v3360_v5  ;;  %v2653_v50 = vld [vmem:[#allocation8 + $0x4] ss:$16 sps:$4 sm:$0xff]   ;;  %v2654_v5 = vld [vmem:[#allocation8 + $0xc] ss:$16 sps:$4 sm:$0xff]  }
 0x710   :  { %1673 = vmatprep.subr.bf16.mxu1 %v3363_v19  ;;  %1714 = vmatprep.subr.bf16.mxu0 %v3366_v43  ;;  %v2655_v19 = vld [vmem:[#allocation8] ss:$16 sps:$4 sm:$0xff]   ;;  %v2656_v43 = vld [vmem:[#allocation8 + $0x8] ss:$16 sps:$4 sm:$0xff]  }
 0x711   :  { %1703 = vmatprep.mubr.bf16.mxu1 %v3535_v46  ;;  %1744 = vmatprep.mubr.bf16.mxu0 %v3535_v46 }
 0x713   :  { %1674 = vmatpush1.bf16.msra.mxu1 %v3371_v62  ;;  %1715 = vmatpush1.bf16.msra.mxu0 %v3374_v18 }
 0x714   :  { %1675 = vmatprep.subr.bf16.mxu1 %v3377_v44  ;;  %1716 = vmatprep.subr.bf16.mxu0 %v3380_v58  ;;  %v3549_v44 = vld [vmem:[#allocation36_spill] sm:$0xff] }
 0x717   :  { %1676 = vmatpush1.bf16.msra.mxu1 %v3383_v7  ;;  %1717 = vmatpush1.bf16.msra.mxu0 %v3386_v13 }
 0x718   :  { %1677 = vmatprep.subr.bf16.mxu1 %v3389_v25  ;;  %1718 = vmatprep.subr.bf16.mxu0 %v3392_v6  ;;  %v3550_v6 = vld [vmem:[#allocation38_spill] sm:$0xff] }
 0x71b   :  { %1678 = vmatpush1.bf16.msra.mxu1 %v3395_v51  ;;  %1719 = vmatpush1.bf16.msra.mxu0 %v3398_v1 }
 0x71c   :  { %1679 = vmatprep.subr.bf16.mxu1 %v3401_v56  ;;  %1720 = vmatprep.subr.bf16.mxu0 %v3404_v57 }
 0x71f   :  { %1680 = vmatpush1.bf16.msra.mxu1 %v3407_v60  ;;  %1721 = vmatpush1.bf16.msra.mxu0 %v3410_v61 }
 0x720   :  { %1681 = vmatprep.subr.bf16.mxu1 %v3413_v63  ;;  %1722 = vmatprep.subr.bf16.mxu0 %v3416_v0  ;;  %v3551_v63 = vld [vmem:[#allocation39_spill] sm:$0xff] }
 0x723   :  { %1682 = vmatpush1.bf16.msra.mxu1 %v2647_v38  ;;  %1723 = vmatpush1.bf16.msra.mxu0 %v2648_v20  ;;  %v2482_v38 = vld [vmem:[#allocation11 + $0x38] sm:$0xff]   ;;  %v2483_v20 = vld [vmem:[#allocation11 + $0x70] sm:$0xff]  }
 0x724   :  { %1683 = vmatprep.subr.bf16.mxu1 %v2649_v39  ;;  %1724 = vmatprep.subr.bf16.mxu0 %v2650_v54  ;;  %v2484_v39 = vld [vmem:[#allocation11 + $0x30] sm:$0xff]   ;;  %v2485_v54 = vld [vmem:[#allocation11 + $0x68] sm:$0xff]  }
 0x727   :  { %1684 = vmatpush1.bf16.msra.mxu1 %v2651_v36  ;;  %1725 = vmatpush1.bf16.msra.mxu0 %v2652_v31  ;;  %v2486_v36 = vld [vmem:[#allocation11 + $0x28] sm:$0xff]   ;;  %v2487_v31 = vld [vmem:[#allocation11 + $0x60] sm:$0xff]  }
 0x728   :  { %1685 = vmatprep.subr.bf16.mxu1 %v2653_v50  ;;  %1726 = vmatprep.subr.bf16.mxu0 %v2654_v5  ;;  %v2488_v50 = vld [vmem:[#allocation11 + $0x20] sm:$0xff]   ;;  %v2489_v5 = vld [vmem:[#allocation11 + $0x58] sm:$0xff]  }
 0x72b   :  { %1686 = vmatpush1.bf16.msra.mxu1 %v2655_v19  ;;  %1727 = vmatpush1.bf16.msra.mxu0 %v2656_v43  ;;  %v2490_v19 = vld [vmem:[#allocation11 + $0x18] sm:$0xff]   ;;  %v2491_v43 = vld [vmem:[#allocation11 + $0x50] sm:$0xff]  }
 0x72c   :  { %1895 = vmatprep.subr.bf16.mxu1 %v2459_v15  ;;  %2307 = vmatprep.subr.bf16.mxu0 %v2481_v49  ;;  %v2495_v15 = vld [vmem:[#allocation11 + $0x40] sm:$0xff]  }
 0x7ce   :  { %v1587_v62 = vpop.f32.mrf.mxu1  ;;  %v1628_v18 = vpop.f32.mrf.mxu0 }
 0x7cf   :  { %v1635_v58 = vadd.f32 %v1587_v62, %v3549_v44  ;;  %v1637_v24 = vadd.f32 %v1628_v18, %v3552_v23  ;;  %v2492_v62 = vld [vmem:[#allocation11 + $0x10] sm:$0xff]  }
 0x7d0   :  { %v1589_v7 = vpop.f32.mrf.mxu1  ;;  %v1630_v13 = vpop.f32.mrf.mxu0 }
 0x7d1   :  { %v2262_v25 = vmul.f32 -1.442695, %v1635_v58  ;;  %v1636_v51 = vadd.f32 %v1589_v7, %v3550_v6  ;;  %v1638_v0 = vadd.f32 %v1630_v13, %v3551_v63  ;;  %v3553_v58 = vld [vmem:[#allocation40_spill] sm:$0xff] }
 0x7d2   :  { %v1591_v1 = vpop.f32.mrf.mxu1  ;;  %v1632_v56 = vpop.f32.mrf.mxu0 }
 0x7d3   :  { %2593 = vpow2.f32 %v2262_v25  ;;  %v2263_v57 = vmul.f32 -1.442695, %v1636_v51  ;;  %v2264_v27 = vmul.f32 -1.442695, %v1638_v0  ;;  %v3554_v0 = vld [vmem:[#allocation41_spill] sm:$0xff] }
 0x7d4   :  { %v1592_v60 = vpop.f32.mrf.mxu1  ;;  %v1633_v61 = vpop.f32.mrf.mxu0 }
 0x7d5   :  { %2595 = vpow2.f32 %v2263_v57 }
 0x7d6   :  { %2597 = vtanh.f32 %v1637_v24 }
 0x7d7   :  { %2599 = vpow2.f32 %v2264_v27 }
 0x7e0   :  { %v2594_v28 = vpop.eup %2593 }
 0x7e1   :  { %v1642_v3 = vadd.f32 1.0, %v2594_v28 }
 0x7e2   :  { %v2596_v29 = vpop.eup %2595 }
 0x7e3   :  { %2601 = vrcp.f32 %v1642_v3  ;;  %v1648_v4 = vadd.f32 1.0, %v2596_v29  ;;  %v2598_v30 = vpop.eup %2597 }
 0x7e4   :  { %v2600_v8 = vpop.eup %2599 }
 0x7e5   :  { %2603 = vrcp.f32 %v1648_v4  ;;  %v1655_v34 = vadd.f32 1.0, %v2600_v8 }
 0x7e7   :  { %2605 = vrcp.f32 %v1655_v34 }
 0x7f0   :  { %v2602_v32 = vpop.eup %2601 }
 0x7f1   :  { %v1659_v9 = vmul.f32 %v2602_v32, %v2598_v30 }
 0x7f2   :  { %v2604_v33 = vpop.eup %2603 }
 0x7f3   :  { %v1658_v10 = vmul.f32 %v2604_v33, %v3436_v42  ;;  %v2477_v42 = vld [vmem:[#allocation10 + $0x14] ss:$8 sps:$4 sm:$0xff]  }
 0x7f4   :  { %v2606_v52 = vpop.eup %2605 }
 0x7f5   :  { %v3466_v35 = vadd.f32 %v1659_v9, %v1658_v10 }
 0x7f7   :  { %2607 = vtanh.f32 %v3466_v35 }
 0x804   :  { %v2608_v11 = vpop.eup %2607 }
 0x805   :  { %v1662_v53 = vmul.f32 %v2608_v11, %v2606_v52 }
 0x807   :  { %v1670_v14 = vpack.c.bf16 %v1662_v53, %v1662_v53  ;;  %v2493_v53 = vld [vmem:[#allocation11 + $0x48] sm:$0xff]  }
 0x809   :  { %1704 = vmatmul.mubr.bf16.vlgmr.msra.gmra.mxu1 %v1670_v14  ;;  %1745 = vmatmul.mubr.bf16.vlgmr.msra.gmra.mxu0 %v1670_v14  ;;  %v2494_v14 = vld [vmem:[#allocation11 + $0x8] sm:$0xff]  }
 0x80a   :  { %1927 = vmatprep.mubr.bf16.mxu1 %v3535_v46  ;;  %1896 = vmatpush1.bf16.msra.mxu1 %v2457_v16  ;;  %v2472_v46 = vld [vmem:[#allocation10 + $0x20] ss:$8 sps:$4 sm:$0xff]  }
 0x80b   :  { %1897 = vmatprep.subr.bf16.mxu1 %v2462_v17  ;;  %2308 = vmatpush3.bf16.msra.mxu0 %v2482_v38  ;;  %v2496_v16 = vld [vmem:[#allocation11] sm:$0xff]   ;;  %v3555_v17 = vld [vmem:[#allocation22_spill] sm:$0xff] }
 0x80c   :  { %2309 = vmatprep.subr.bf16.mxu0 %v2483_v20 }
 0x80e   :  { %1898 = vmatpush1.bf16.msra.mxu1 %v2460_v21  ;;  %v3556_v21 = vsub.s32 0, %v3555_v17 }
 0x80f   :  { %1899 = vmatprep.subr.bf16.mxu1 %v2465_v22  ;;  %2310 = vmatpush3.bf16.msra.mxu0 %v2484_v39 }
 0x810   :  { %2311 = vmatprep.subr.bf16.mxu0 %v2485_v54 }
 0x812   :  { %1900 = vmatpush1.bf16.msra.mxu1 %v2463_v37  ;;  %v3557_v37 = vsub.s32 1, %v3555_v17 }
 0x813   :  { %1901 = vmatprep.subr.bf16.mxu1 %v2468_v45  ;;  %2312 = vmatpush3.bf16.msra.mxu0 %v2486_v36 }
 0x814   :  { %2313 = vmatprep.subr.bf16.mxu0 %v2487_v31 }
 0x816   :  { %1902 = vmatpush1.bf16.msra.mxu1 %v2466_v26 }
 0x817   :  { %1903 = vmatprep.subr.bf16.mxu1 %v2471_v55  ;;  %2314 = vmatpush3.bf16.msra.mxu0 %v2488_v50 }
 0x818   :  { %2315 = vmatprep.subr.bf16.mxu0 %v2489_v5 }
 0x81a   :  { %1904 = vmatpush1.bf16.msra.mxu1 %v2469_v47 }
 0x81b   :  { %1905 = vmatprep.subr.bf16.mxu1 %v2474_v2  ;;  %2316 = vmatpush3.bf16.msra.mxu0 %v2490_v19 }
 0x81c   :  { %2317 = vmatprep.subr.bf16.mxu0 %v2491_v43 }
 0x81e   :  { %1906 = vmatpush1.bf16.msra.mxu1 %v2472_v46 }
 0x81f   :  { %1907 = vmatprep.subr.bf16.mxu1 %v2477_v42  ;;  %2318 = vmatpush3.bf16.msra.mxu0 %v2492_v62 }
 0x820   :  { %2319 = vmatprep.subr.bf16.mxu0 %v2493_v53 }
 0x822   :  { %1908 = vmatpush1.bf16.msra.mxu1 %v2475_v12 }
 0x823   :  { %1909 = vmatprep.subr.bf16.mxu1 %v2480_v40  ;;  %2320 = vmatpush3.bf16.msra.mxu0 %v2494_v14 }
 0x824   :  { %2321 = vmatprep.subr.bf16.mxu0 %v2495_v15 }
 0x826   :  { %1910 = vmatpush1.bf16.msra.mxu1 %v2478_v59 }
 0x827   :  { %2322 = vmatpush3.bf16.msra.mxu0 %v2496_v16 }
 0x8c9   :  { %v1705_v18 = vpop.f32.mrf.mxu1  ;;  %v1746_v44 = vpop.f32.mrf.mxu0 }
 0x8ca   :  { %v1753_v7 = vadd.f32 %v1705_v18, %v3553_v58  ;;  %v1755_v23 = vadd.f32 %v1746_v44, %v3554_v0 }
 0x8cb   :  { %v1707_v13 = vpop.f32.mrf.mxu1  ;;  %v1748_v25 = vpop.f32.mrf.mxu0 }
 0x8cc   :  { %v2265_v6 = vmul.f32 -1.442695, %v1753_v7  ;;  %v1754_v51 = vadd.f32 %v1707_v13, %v3169_v48  ;;  %v1756_v63 = vadd.f32 %v1748_v25, %v3172_v41 }
 0x8cd   :  { %v1709_v1 = vpop.f32.mrf.mxu1  ;;  %v1750_v56 = vpop.f32.mrf.mxu0 }
 0x8ce   :  { %2609 = vpow2.f32 %v2265_v6  ;;  %v2266_v57 = vmul.f32 -1.442695, %v1754_v51  ;;  %v2267_v24 = vmul.f32 -1.442695, %v1756_v63 }
 0x8cf   :  { %v1710_v60 = vpop.f32.mrf.mxu1  ;;  %v1751_v61 = vpop.f32.mrf.mxu0 }
 0x8d0   :  { %2611 = vpow2.f32 %v2266_v57 }
 0x8d1   :  { %2613 = vtanh.f32 %v1755_v23 }
 0x8d2   :  { %2615 = vpow2.f32 %v2267_v24 }
 0x8db   :  { %v2610_v27 = vpop.eup %2609 }
 0x8dc   :  { %v1760_v28 = vadd.f32 1.0, %v2610_v27 }
 0x8dd   :  { %v2612_v3 = vpop.eup %2611 }
 0x8de   :  { %2617 = vrcp.f32 %v1760_v28  ;;  %v1766_v29 = vadd.f32 1.0, %v2612_v3  ;;  %v2614_v48 = vpop.eup %2613 }
 0x8df   :  { %v2616_v4 = vpop.eup %2615 }
 0x8e0   :  { %2619 = vrcp.f32 %v1766_v29  ;;  %v1773_v9 = vadd.f32 1.0, %v2616_v4 }
 0x8e2   :  { %2621 = vrcp.f32 %v1773_v9 }
 0x8eb   :  { %v2618_v30 = vpop.eup %2617 }
 0x8ec   :  { %v1777_v8 = vmul.f32 %v2618_v30, %v2614_v48 }
 0x8ed   :  { %v2620_v32 = vpop.eup %2619 }
 0x8ee   :  { %v1776_v33 = vmul.f32 %v2620_v32, %v3466_v35  ;;  %v1803_v35 = vld [vmem:[%s3503_s9] sm:$0x3]  ;;  %s2134_s9 = sshll.u32 %s2818_s16, 4  ;;  %s2135_s9 = int_to_ptr.vmem [resolvable:$true] %s2134_s9 }
 0x8ef   :  { %v2622_v34 = vpop.eup %2621  ;;  %v1808_v22 = vrot.slane %v1803_v35, %v3556_v21  ;;  %v1812_v45 = vrot.slane %v1803_v35, %v3557_v37  ;;  %s2737_s18 = scalar_lea.vmem %s2135_s9, 128  ;;  %p2742_p7 = scmp.lt.s32.totalorder %s2135_s9, %s2135_s9 }
 0x8f0   :  { %v1778_v41 = vadd.f32 %v1777_v8, %v1776_v33  ;;  %p2738_p6 = scmp.ne.s32.totalorder %s2135_s9, %s2737_s18  ;;  %p2743_p8 = scmp.lt.s32.totalorder %s2737_s18, %s2737_s18 }
 0x8f2   :  { %2117 = vst [vmem:[#allocation16] sm:$0xff] %v1778_v41  ;;  %2623 = vtanh.f32 %v1778_v41  ;;  %p2744_p9 = por %p2743_p8, %p2742_p7 }
 0x8f4   :  { %p2745_p10 = pnand %p2744_p9, %p2738_p6 }
 0x8ff   :  { %v2624_v10 = vpop.eup %2623 }
 0x900   :  { %v1780_v52 = vmul.f32 %v2624_v10, %v2622_v34 }
 0x902   :  { %v1786_v11 = vpack.c.bf16 %v1780_v52, %v1780_v52  ;;  %2116 = vst [vmem:[#allocation14] sm:$0xff] %v1780_v52 }
 0x904   :  { %1928 = vmatmul.mubr.bf16.vlgmr.msra.gmra.mxu1 %v1786_v11 }
 0x9c4   :  { %v1929_v26 = vpop.f32.mrf.mxu1 }
 0x9c5   :  { %v1930_v47 = vadd.f32 %v1929_v26, %v1808_v22 }
 0x9c6   :  { %v1931_v55 = vpop.f32.mrf.mxu1 }
 0x9c7   :  { %v1932_v2 = vadd.f32 %v1931_v55, %v1812_v45  ;;  %v1936_v46 = vmax.f32 %v1930_v47, 0.0 }
 0x9c8   :  { %v1933_v42 = vpop.f32.mrf.mxu1 }
 0x9c9   :  { %v1937_v12 = vmax.f32 %v1932_v2, 0.0  ;;  %v1938_v49 = vpack.c.bf16 %v1936_v46, %v1936_v46 }
 0x9ca   :  { %v1934_v40 = vpop.f32.mrf.mxu1 }
 0x9cb   :  { %v1939_v59 = vpack.c.bf16 %v1937_v12, %v1937_v12 }
 0x9cd   :  { %2107 = vmatprep.mubr.bf16.mxu0 %v1939_v59 }
 0x9ce   :  { %2108 = vmatmul.mubr.bf16.vlgmr.msra.gmra.mxu0 %v1938_v49 }
 0x9cf   :  { %2748 = shalt.err (!%p2745_p10)
}
 0x9d0   :  { %2137 = dma.vmem_to_hbm [thread:$0]  %s2135_s9, 128, %s3507_s13, [#allocation15]  }
 0x9d1   :  { %s2819_s8 = smov [#allocation16]  }
 0x9d2   :  { %s2144_s21 = sshll.u32 %s2819_s8, 4  ;;  %s2145_s21 = int_to_ptr.vmem [resolvable:$true] %s2144_s21 }
 0x9d3   :  { %s2757_s22 = scalar_lea.vmem %s2145_s21, 128  ;;  %p2762_p12 = scmp.lt.s32.totalorder %s2145_s21, %s2145_s21 }
 0x9d4   :  { %p2758_p11 = scmp.ne.s32.totalorder %s2145_s21, %s2757_s22  ;;  %p2763_p13 = scmp.lt.s32.totalorder %s2757_s22, %s2757_s22 }
 0x9d6   :  { %p2764_p0 = por %p2763_p13, %p2762_p12 }
 0x9d8   :  { %p2765_p1 = pnand %p2764_p0, %p2758_p11 }
 0x9da   :  { %2768 = shalt.err (!%p2765_p1)
}
 0x9db   :  { %2147 = dma.vmem_to_hbm [thread:$0]  %s2145_s21, 128, %s3508_s14, [#allocation15]   ;;  %v2284_v20 = vld [vmem:[%s3505_s11] ss:$0 sm:$0xff] }
 0x9dc   :  { %s2820_s13 = smov [#allocation13]  }
 0x9dd   :  { %s2124_s26 = sshll.u32 %s2820_s13, 4  ;;  %s2125_s26 = int_to_ptr.vmem [resolvable:$true] %s2124_s26 }
 0x9de   :  { %s2777_s27 = scalar_lea.vmem %s2125_s26, 128  ;;  %p2782_p3 = scmp.lt.s32.totalorder %s2125_s26, %s2125_s26 }
 0x9df   :  { %p2778_p2 = scmp.ne.s32.totalorder %s2125_s26, %s2777_s27  ;;  %p2783_p4 = scmp.lt.s32.totalorder %s2777_s27, %s2777_s27 }
 0x9e1   :  { %p2784_p5 = por %p2783_p4, %p2782_p3 }
 0x9e3   :  { %p2785_p6 = pnand %p2784_p5, %p2778_p2 }
 0xa8e   :  { %v2323_v38 = vpop.f32.mrf.mxu0 }
 0xa90   :  { %v2324_v39 = vpop.f32.mrf.mxu0 }
 0xa91   :  { %v2325_v54 = vadd.f32 %v2324_v39, %v2323_v38 }
 0xa92   :  { %v2326_v36 = vpop.f32.mrf.mxu0 }
 0xa93   :  { %v2110_v31 = vadd.f32 %v2325_v54, %v2284_v20 }
 0xa94   :  { %v2327_v50 = vpop.f32.mrf.mxu0 }
 0xa95   :  { %2115 = vst [vmem:[#allocation13] sm:$0xff] %v2110_v31 }
 0xa96   :  { %2788 = shalt.err (!%p2785_p6)
}
 0xa97   :  { %2127 = dma.vmem_to_hbm [thread:$0]  %s2125_s26, 128, %s3506_s12, [#allocation7]  }
 0xa98   :  { %2803 = dma.done.wait [#allocation7], 128  }
 0xa99   :  { %2804 = vsyncadd [#allocation7], 4294967168 }
 0xa9a   :  { %2805 = dma.done.wait [#allocation15], 256  }
 0xa9b   :  { %2806 = vsyncadd [#allocation15], 4294967040 }
 0xa9c   :  { %2157 = vsyncpa [#allocation6], 1 }
 0xa9d   :  { %2158 = vsyncpa [#allocation9], 1 }
 0xa9e   :  { %2159 = vsyncpa [#allocation12], 1 }
 0xa9f   :  { %2160 = vsyncpa [#allocation7], 1 }
 0xaa0   :  { %2161 = vsyncpa [#allocation15], 1 }

</bundles_post_ra>
